<compile_context>
chip_gen: v7x
topology: tpu7x:2x2x1
jax: 0.10.0
libtpu: 0.0.40
codegen_flags: <defaults>
</compile_context>

<pallas_src>
import functools

import jax
import jax.numpy as jnp
from jax.experimental import pallas as pl
from jax.experimental.pallas import tpu as pltpu


# ---------------------------------------------------------------------------
# Kernel 1: XW = X @ W   (hoisted prologue matmul, tiled over rows)
# ---------------------------------------------------------------------------
def _xw_kernel(x_ref, w_ref, o_ref):
    o_ref[...] = jnp.dot(
        x_ref[...], w_ref[...], preferred_element_type=jnp.float32
    ).astype(o_ref.dtype)


# ---------------------------------------------------------------------------
# Kernel 2: AXW = A @ XW  with fused ReLU + inverted dropout at write-out.
#   grid = (N // TM, N // TK); f32 accumulator resident across the k axis.
# ---------------------------------------------------------------------------
def _propagate_kernel(adj_ref, xw_ref, *rest, dropout_prob, training):
    if training and dropout_prob > 0.0:
        rand_ref, o_ref, acc_ref = rest
    else:
        rand_ref = None
        o_ref, acc_ref = rest

    k = pl.program_id(1)

    @pl.when(k == 0)
    def _init():
        acc_ref[...] = jnp.zeros_like(acc_ref)

    acc_ref[...] += jnp.dot(
        adj_ref[...], xw_ref[...], preferred_element_type=jnp.float32
    )

    @pl.when(k == pl.num_programs(1) - 1)
    def _finalize():
        h = jnp.maximum(acc_ref[...], 0.0)  # ReLU (f32 VPU path)
        if rand_ref is not None:
            if dropout_prob >= 1.0:
                h = jnp.zeros_like(h)
            else:
                # Inverted dropout; scale folded into the select (one mul).
                keep = rand_ref[...] >= jnp.float32(dropout_prob)
                h = h * jnp.where(
                    keep,
                    jnp.float32(1.0 / (1.0 - dropout_prob)),
                    jnp.float32(0.0),
                )
        o_ref[...] = h.astype(o_ref.dtype)


# ---------------------------------------------------------------------------
# Wrappers
# ---------------------------------------------------------------------------
def _pick_tile(n, candidates=(256, 128)):
    for t in candidates:
        if n % t == 0:
            return t
    return n  # fall back to the full (small) dimension


def _xw_matmul(x_bf16, w_bf16):
    n, f_in = x_bf16.shape
    f_out = w_bf16.shape[1]
    tm = _pick_tile(n)
    cost = pl.CostEstimate(
        flops=2 * n * f_in * f_out,
        transcendentals=0,
        bytes_accessed=2 * (n * f_in + f_in * f_out + n * f_out),
    )
    return pl.pallas_call(
        _xw_kernel,
        out_shape=jax.ShapeDtypeStruct((n, f_out), jnp.bfloat16),
        grid=(n // tm,),
        in_specs=[
            pl.BlockSpec((tm, f_in), lambda i: (i, 0)),
            pl.BlockSpec((f_in, f_out), lambda i: (0, 0)),
        ],
        out_specs=pl.BlockSpec((tm, f_out), lambda i: (i, 0)),
        compiler_params=pltpu.CompilerParams(dimension_semantics=("parallel",)),
        cost_estimate=cost,
    )(x_bf16, w_bf16)


def _propagate(adj_bf16, xw_bf16, rand, dropout_prob, training):
    n = adj_bf16.shape[0]
    f_out = xw_bf16.shape[1]
    tm = _pick_tile(n)
    tk = _pick_tile(n)

    kernel = functools.partial(
        _propagate_kernel,
        dropout_prob=float(dropout_prob),
        training=bool(training),
    )

    in_specs = [
        pl.BlockSpec((tm, tk), lambda i, k: (i, k)),     # adjacency tile
        pl.BlockSpec((tk, f_out), lambda i, k: (k, 0)),  # XW tile (reduction side)
    ]
    inputs = [adj_bf16, xw_bf16]
    use_dropout = training and dropout_prob > 0.0
    if use_dropout:
        in_specs.append(pl.BlockSpec((tm, f_out), lambda i, k: (i, 0)))  # randoms
        inputs.append(rand)

    bytes_accessed = sum(int(a.size) * a.dtype.itemsize for a in inputs) + 4 * n * f_out
    cost = pl.CostEstimate(
        flops=2 * n * n * f_out, transcendentals=0, bytes_accessed=bytes_accessed
    )

    return pl.pallas_call(
        kernel,
        out_shape=jax.ShapeDtypeStruct((n, f_out), jnp.float32),
        grid=(n // tm, n // tk),
        in_specs=in_specs,
        out_specs=pl.BlockSpec((tm, f_out), lambda i, k: (i, 0)),
        scratch_shapes=[pltpu.VMEM((tm, f_out), jnp.float32)],
        compiler_params=pltpu.CompilerParams(
            dimension_semantics=("parallel", "arbitrary")
        ),
        cost_estimate=cost,
    )(*inputs)


def gcn_layer(x, adjacency, w, *, dropout_prob, training, rng_key):
    """One GCN_Layer.forward: dropout(relu(A @ (x @ W)))."""
    x_b = x.astype(jnp.bfloat16)
    a_b = adjacency.astype(jnp.bfloat16)
    w_b = w.astype(jnp.bfloat16)

    xw = _xw_matmul(x_b, w_b)  # (N, F_out) bf16, hoisted out of the A-reduction

    rand = None
    if training and dropout_prob > 0.0:
        rand = jax.random.uniform(
            rng_key, (x.shape[0], w.shape[1]), dtype=jnp.float32
        )
    return _propagate(a_b, xw, rand, dropout_prob, training)


@functools.partial(jax.jit, static_argnames=("dropout_prob", "training"))
def gcn_model_forward(features, adjacency, weights, rng_key, *,
                      dropout_prob=0.5, training=False):
    """GCN_Model.forward: run all layers, concatenate their outputs on dim=1."""
    keys = jax.random.split(rng_key, len(weights))
    h = features
    layer_outputs = []
    for w, k in zip(weights, keys):
        h = gcn_layer(h, adjacency, w,
                      dropout_prob=dropout_prob, training=training, rng_key=k)
        layer_outputs.append(h)
    # torch.cat(layers, dim=1): pure layout op, done outside the kernels.
    return jnp.concatenate(layer_outputs, axis=1)


def xavier_uniform(key, fan_in, fan_out, dtype=jnp.float32):
    # torch.nn.init.xavier_uniform_ (gain=1): U(-a, a), a = sqrt(6/(fan_in+fan_out))
    bound = (6.0 / (fan_in + fan_out)) ** 0.5
    return jax.random.uniform(
        key, (fan_in, fan_out), minval=-bound, maxval=bound, dtype=dtype
    )


if __name__ == "__main__":
    # Small shapes: 512 graph nodes, 64 input features, hidden 128, 2 layers.
    N, F_IN, HIDDEN, NUM_LAYERS = 512, 64, 128, 2
    DROPOUT_P = 0.5

    root = jax.random.PRNGKey(0)
    k_x, k_adj, k_w1, k_w2, k_drop = jax.random.split(root, 5)

    features = jax.random.normal(k_x, (N, F_IN), dtype=jnp.float32)

    # Row-normalized dense adjacency with self loops.
    a_raw = (jax.random.uniform(k_adj, (N, N)) > 0.9).astype(jnp.float32)
    adj = a_raw + a_raw.T + jnp.eye(N, dtype=jnp.float32)
    deg = jnp.sum(adj, axis=1, keepdims=True)
    adj = adj / jnp.maximum(deg, 1.0)

    W1 = xavier_uniform(k_w1, F_IN, HIDDEN)
    W2 = xavier_uniform(k_w2, HIDDEN, HIDDEN)
    weights = (W1, W2)

    # ---- Eval mode (dropout is identity): compare against a plain-JAX
    # ---- reference that applies the same bf16 operand casts.
    out_eval = gcn_model_forward(features, adj, weights, k_drop,
                                 dropout_prob=DROPOUT_P, training=False)
    out_eval = jax.block_until_ready(out_eval)
    assert out_eval.shape == (N, NUM_LAYERS * HIDDEN)

    def ref_layer(x, a, w):
        xb, ab, wb = (t.astype(jnp.bfloat16) for t in (x, a, w))
        xw = jnp.dot(xb, wb, preferred_element_type=jnp.float32).astype(jnp.bfloat16)
        return jnp.maximum(jnp.dot(ab, xw, preferred_element_type=jnp.float32), 0.0)

    h1 = ref_layer(features, adj, W1)
    h2 = ref_layer(h1, adj, W2)
    ref = jnp.concatenate([h1, h2], axis=1)
    assert jnp.allclose(out_eval, ref, atol=2e-2, rtol=2e-2), "eval-mode mismatch"

    # ---- Training mode (stochastic dropout): sanity checks only.
    out_train = gcn_model_forward(features, adj, weights, k_drop,
                                  dropout_prob=DROPOUT_P, training=True)
    out_train = jax.block_until_ready(out_train)
    assert out_train.shape == (N, NUM_LAYERS * HIDDEN)
    assert bool(jnp.all(jnp.isfinite(out_train)))
    assert bool(jnp.any(out_train == 0.0))  # dropped / ReLU-clipped entries exist

    print("KERNEL_OK")
</pallas_src>

<mosaic_0001>
module attributes {stable_mosaic.version = 11 : i64} {
  func.func @_xw_kernel(%arg0: i32, %arg1: memref<256x64xbf16, #tpu.memory_space<vmem>>, %arg2: memref<64x128xbf16, #tpu.memory_space<vmem>>, %arg3: memref<256x128xbf16, #tpu.memory_space<vmem>>) attributes {dimension_semantics = [#tpu.dimension_semantics<parallel>], iteration_bounds = array<i64: 2>, scalar_prefetch = 0 : i64, scratch_operands = 0 : i64, tpu.core_type = #tpu.core_type<tc>, window_params = [{transform_indices = @transform_0, window_bounds = array<i64: 256, 64>}, {pipeline_mode = #tpu.pipeline_mode<synchronous>, transform_indices = @transform_1, window_bounds = array<i64: 64, 128>}, {transform_indices = @transform_2, window_bounds = array<i64: 256, 128>}]} {
    %c0 = arith.constant 0 : index
    %c0_0 = arith.constant 0 : index
    %0 = vector.load %arg1[%c0, %c0_0] : memref<256x64xbf16, #tpu.memory_space<vmem>>, vector<256x64xbf16>
    %c0_1 = arith.constant 0 : index
    %c0_2 = arith.constant 0 : index
    %1 = vector.load %arg2[%c0_1, %c0_2] : memref<64x128xbf16, #tpu.memory_space<vmem>>, vector<64x128xbf16>
    %cst = arith.constant dense<0.000000e+00> : vector<256x128xf32>
    %2 = tpu.matmul %0, %1, %cst {dimension_numbers = #tpu.dot_dimension_numbers<[1], [0], [0], [1], [0, 0, 1, 1], [], []>} : vector<256x64xbf16>, vector<64x128xbf16>, vector<256x128xf32> -> vector<256x128xf32>
    %3 = arith.truncf %2 : vector<256x128xf32> to vector<256x128xbf16>
    %c0_3 = arith.constant 0 : index
    %c0_4 = arith.constant 0 : index
    %4 = vector.load %arg3[%c0_3, %c0_4] : memref<256x128xbf16, #tpu.memory_space<vmem>>, vector<256x128xbf16>
    tpu.vector_store %arg3[%c0_3, %c0_4], %3 {strides = array<i32>} : memref<256x128xbf16, #tpu.memory_space<vmem>>, vector<256x128xbf16>,
    return
  }
  func.func @transform_0(%arg0: i32) -> (i32, i32) {
    %c0_i32 = arith.constant 0 : i32
    %c0_i32_0 = arith.constant 0 : i32
    return %arg0, %c0_i32 : i32, i32
  }
  func.func @transform_1(%arg0: i32) -> (i32, i32) {
    %c0_i32 = arith.constant 0 : i32
    %c0_i32_0 = arith.constant 0 : i32
    %c0_i32_1 = arith.constant 0 : i32
    return %c0_i32, %c0_i32_0 : i32, i32
  }
  func.func @transform_2(%arg0: i32) -> (i32, i32) {
    %c0_i32 = arith.constant 0 : i32
    %c0_i32_0 = arith.constant 0 : i32
    return %arg0, %c0_i32 : i32, i32
  }
}

module attributes {stable_mosaic.version = 11 : i64} {
  func.func @_propagate_kernel(%arg0: i32, %arg1: i32, %arg2: memref<256x256xbf16, #tpu.memory_space<vmem>>, %arg3: memref<256x128xbf16, #tpu.memory_space<vmem>>, %arg4: memref<256x128xf32, #tpu.memory_space<vmem>>, %arg5: memref<256x128xf32, #tpu.memory_space<vmem>>) attributes {dimension_semantics = [#tpu.dimension_semantics<parallel>, #tpu.dimension_semantics<arbitrary>], iteration_bounds = array<i64: 2, 2>, scalar_prefetch = 0 : i64, scratch_operands = 1 : i64, tpu.core_type = #tpu.core_type<tc>, window_params = [{transform_indices = @transform_0, window_bounds = array<i64: 256, 256>}, {transform_indices = @transform_1, window_bounds = array<i64: 256, 128>}, {transform_indices = @transform_2, window_bounds = array<i64: 256, 128>}]} {
    %c0_i32 = arith.constant 0 : i32
    %0 = arith.cmpi eq, %arg1, %c0_i32 : i32
    %1 = arith.extui %0 : i1 to i32
    %c0_i32_0 = arith.constant 0 : i32
    %2 = arith.cmpi ne, %1, %c0_i32_0 : i32
    scf.if %2 {
      %cst_9 = arith.constant 0.000000e+00 : f32
      %12 = vector.broadcast %cst_9 : f32 to vector<256x128xf32>
      %c0_10 = arith.constant 0 : index
      %c0_11 = arith.constant 0 : index
      %13 = vector.load %arg5[%c0_10, %c0_11] : memref<256x128xf32, #tpu.memory_space<vmem>>, vector<256x128xf32>
      tpu.vector_store %arg5[%c0_10, %c0_11], %12 {strides = array<i32>} : memref<256x128xf32, #tpu.memory_space<vmem>>, vector<256x128xf32>,
    } else {
    }
    %c0 = arith.constant 0 : index
    %c0_1 = arith.constant 0 : index
    %3 = vector.load %arg5[%c0, %c0_1] : memref<256x128xf32, #tpu.memory_space<vmem>>, vector<256x128xf32>
    %c0_2 = arith.constant 0 : index
    %c0_3 = arith.constant 0 : index
    %4 = vector.load %arg2[%c0_2, %c0_3] : memref<256x256xbf16, #tpu.memory_space<vmem>>, vector<256x256xbf16>
    %c0_4 = arith.constant 0 : index
    %c0_5 = arith.constant 0 : index
    %5 = vector.load %arg3[%c0_4, %c0_5] : memref<256x128xbf16, #tpu.memory_space<vmem>>, vector<256x128xbf16>
    %cst = arith.constant dense<0.000000e+00> : vector<256x128xf32>
    %6 = tpu.matmul %4, %5, %cst {dimension_numbers = #tpu.dot_dimension_numbers<[1], [0], [0], [1], [0, 0, 1, 1], [], []>} : vector<256x256xbf16>, vector<256x128xbf16>, vector<256x128xf32> -> vector<256x128xf32>
    %7 = arith.addf %3, %6 : vector<256x128xf32>
    %c0_6 = arith.constant 0 : index
    %c0_7 = arith.constant 0 : index
    %8 = vector.load %arg5[%c0_6, %c0_7] : memref<256x128xf32, #tpu.memory_space<vmem>>, vector<256x128xf32>
    tpu.vector_store %arg5[%c0_6, %c0_7], %7 {strides = array<i32>} : memref<256x128xf32, #tpu.memory_space<vmem>>, vector<256x128xf32>,
    %c1_i32 = arith.constant 1 : i32
    %9 = arith.cmpi eq, %arg1, %c1_i32 : i32
    %10 = arith.extui %9 : i1 to i32
    %c0_i32_8 = arith.constant 0 : i32
    %11 = arith.cmpi ne, %10, %c0_i32_8 : i32
    scf.if %11 {
      %c0_9 = arith.constant 0 : index
      %c0_10 = arith.constant 0 : index
      %12 = vector.load %arg5[%c0_9, %c0_10] : memref<256x128xf32, #tpu.memory_space<vmem>>, vector<256x128xf32>
      %cst_11 = arith.constant 0.000000e+00 : f32
      %13 = vector.broadcast %cst_11 : f32 to vector<256x128xf32>
      %14 = arith.maximumf %12, %13 : vector<256x128xf32>
      %c0_12 = arith.constant 0 : index
      %c0_13 = arith.constant 0 : index
      %15 = vector.load %arg4[%c0_12, %c0_13] : memref<256x128xf32, #tpu.memory_space<vmem>>, vector<256x128xf32>
      tpu.vector_store %arg4[%c0_12, %c0_13], %14 {strides = array<i32>} : memref<256x128xf32, #tpu.memory_space<vmem>>, vector<256x128xf32>,
    } else {
    }
    return
  }
  func.func @transform_0(%arg0: i32, %arg1: i32) -> (i32, i32) {
    %c0_i32 = arith.constant 0 : i32
    return %arg0, %arg1 : i32, i32
  }
  func.func @transform_1(%arg0: i32, %arg1: i32) -> (i32, i32) {
    %c0_i32 = arith.constant 0 : i32
    %c0_i32_0 = arith.constant 0 : i32
    return %arg1, %c0_i32 : i32, i32
  }
  func.func @transform_2(%arg0: i32, %arg1: i32) -> (i32, i32) {
    %c0_i32 = arith.constant 0 : i32
    %c0_i32_0 = arith.constant 0 : i32
    return %arg0, %c0_i32 : i32, i32
  }
}

module attributes {stable_mosaic.version = 11 : i64} {
  func.func @_xw_kernel(%arg0: i32, %arg1: memref<256x128xbf16, #tpu.memory_space<vmem>>, %arg2: memref<128x128xbf16, #tpu.memory_space<vmem>>, %arg3: memref<256x128xbf16, #tpu.memory_space<vmem>>) attributes {dimension_semantics = [#tpu.dimension_semantics<parallel>], iteration_bounds = array<i64: 2>, scalar_prefetch = 0 : i64, scratch_operands = 0 : i64, tpu.core_type = #tpu.core_type<tc>, window_params = [{transform_indices = @transform_0, window_bounds = array<i64: 256, 128>}, {pipeline_mode = #tpu.pipeline_mode<synchronous>, transform_indices = @transform_1, window_bounds = array<i64: 128, 128>}, {transform_indices = @transform_2, window_bounds = array<i64: 256, 128>}]} {
    %c0 = arith.constant 0 : index
    %c0_0 = arith.constant 0 : index
    %0 = vector.load %arg1[%c0, %c0_0] : memref<256x128xbf16, #tpu.memory_space<vmem>>, vector<256x128xbf16>
    %c0_1 = arith.constant 0 : index
    %c0_2 = arith.constant 0 : index
    %1 = vector.load %arg2[%c0_1, %c0_2] : memref<128x128xbf16, #tpu.memory_space<vmem>>, vector<128x128xbf16>
    %cst = arith.constant dense<0.000000e+00> : vector<256x128xf32>
    %2 = tpu.matmul %0, %1, %cst {dimension_numbers = #tpu.dot_dimension_numbers<[1], [0], [0], [1], [0, 0, 1, 1], [], []>} : vector<256x128xbf16>, vector<128x128xbf16>, vector<256x128xf32> -> vector<256x128xf32>
    %3 = arith.truncf %2 : vector<256x128xf32> to vector<256x128xbf16>
    %c0_3 = arith.constant 0 : index
    %c0_4 = arith.constant 0 : index
    %4 = vector.load %arg3[%c0_3, %c0_4] : memref<256x128xbf16, #tpu.memory_space<vmem>>, vector<256x128xbf16>
    tpu.vector_store %arg3[%c0_3, %c0_4], %3 {strides = array<i32>} : memref<256x128xbf16, #tpu.memory_space<vmem>>, vector<256x128xbf16>,
    return
  }
  func.func @transform_0(%arg0: i32) -> (i32, i32) {
    %c0_i32 = arith.constant 0 : i32
    %c0_i32_0 = arith.constant 0 : i32
    return %arg0, %c0_i32 : i32, i32
  }
  func.func @transform_1(%arg0: i32) -> (i32, i32) {
    %c0_i32 = arith.constant 0 : i32
    %c0_i32_0 = arith.constant 0 : i32
    %c0_i32_1 = arith.constant 0 : i32
    return %c0_i32, %c0_i32_0 : i32, i32
  }
  func.func @transform_2(%arg0: i32) -> (i32, i32) {
    %c0_i32 = arith.constant 0 : i32
    %c0_i32_0 = arith.constant 0 : i32
    return %arg0, %c0_i32 : i32, i32
  }
}

</mosaic_0001>

<bundles_post_ra>
// kernel: gcn_model_forward.4
= control target key start
LH: loop header
LB: loop body
LE: loop exit
PB: predicated region body
PF: predicated region fallthrough
CT: control target
= control target key end

     0   :  { %s1043_s9 = smov 0   ;;  %s1131_s0 = inlined_call_operand.vmem [shape: bf16[512,64], index: 0, kind: input, shape index: {}]   ;;  %s1132_s1 = inlined_call_operand.vmem [shape: bf16[64,128], index: 1, kind: input, shape index: {}]   ;;  %s1133_s2 = inlined_call_operand.vmem [shape: bf16[512,128], index: 2, kind: output, shape index: {}]  }
   0x1 LB: > { %s718_s10 = sadd.s32 4294967295, %s1026_s9   ;;  %p722_p0 = scmp.ge.s32.totalorder %s1026_s9, 1  ;;  %s1026_s9 = sphi %s1043_s9, %s12_s9  }
   0x2   : > { %p113_p1 = scmp.lt.s32.totalorder %s1026_s9, 3 }
   0x4   : > { %p114_p2 = pnand %p722_p0, %p113_p1 }
   0x5   : > { %v1000_v0 = vld [vmem:[%s1132_s1] sm:$0xff] (!%p114_p2)   ;;  %s723_s13 = sshll.u32 (!%p114_p2), %s718_s10, 5  ;;  %v1001_v1 = vld [vmem:[%s1132_s1 + $0x8] sm:$0xff] (!%p114_p2)   ;;  %v1002_v2 = vld [vmem:[%s1132_s1 + $0x10] sm:$0xff] (!%p114_p2)   ;;  %vm292_vm0 = vcmask (!%p114_p2), 523264  }
   0x6   : > { %117 = sbr.rel (%p114_p2) target bundleno = 264 (0x108), region = 28  ;;  %p136_p3 = scmp.lt.s32.totalorder (!%p114_p2), %s723_s13, 63  ;;  %944 = vmatprep.subr.bf16.mxu0 (!%p114_p2), %v1000_v0  ;;  %984 = vmatprep.subr.bf16.mxu1 (!%p114_p2), %v1000_v0  ;;  %v1003_v3 = vld [vmem:[%s1132_s1 + $0x18] sm:$0xff] (!%p114_p2)  }
   0x7   : > { %945 = vmatpush3.bf16.msra.mxu0 (!%p114_p2), %v1000_v0  ;;  %988 = vmatpush3.bf16.msra.mxu1 (!%p114_p2), %v1000_v0 }
   0x8   : > { %946 = vmatprep.subr.bf16.mxu0 (!%p114_p2), %v1001_v1  ;;  %985 = vmatprep.subr.bf16.mxu1 (!%p114_p2), %v1001_v1 }
   0xb   : > { %947 = vmatpush3.bf16.msra.mxu0 (!%p114_p2), %v1001_v1  ;;  %989 = vmatpush3.bf16.msra.mxu1 (!%p114_p2), %v1001_v1 }
   0xc   : > { %948 = vmatprep.subr.bf16.mxu0 (!%p114_p2), %v1002_v2  ;;  %986 = vmatprep.subr.bf16.mxu1 (!%p114_p2), %v1002_v2 }
   0xd   : > { %s1135_s13 = smov (!%p136_p3, %s723_s13), 63 }
   0xe   : > { %s724_s18 = sshll.u32 %s1135_s13, 2 }
   0xf   : > { %s1071_s23 = scalar_lea.vmem %s1131_s0, %s724_s18  ;;  %949 = vmatpush3.bf16.msra.mxu0 %v1002_v2  ;;  %990 = vmatpush3.bf16.msra.mxu1 %v1002_v2  ;;  %s1110_s26 = scalar_lea.vmem %s1133_s2, %s724_s18 }
  0x10   : > { %v1004_v4 = vld [vmem:[%s1071_s23] sm:$0xff]   ;;  %950 = vmatprep.subr.bf16.mxu0 %v1003_v3  ;;  %987 = vmatprep.subr.bf16.mxu1 %v1003_v3  ;;  %v1006_v6 = vld [vmem:[%s1071_s23 + $0x8] sm:$0xff]   ;;  %v1008_v8 = vld [vmem:[%s1071_s23 + $0x10] sm:$0xff]  }
  0x11   : > { %v1005_v5 = vld [vmem:[%s1071_s23 + $0x40] sm:$0xff]   ;;  %952 = vmatprep.mubr.msk.bf16.mxu0 %vm292_vm0, %v1004_v4  ;;  %v1007_v7 = vld [vmem:[%s1071_s23 + $0x48] sm:$0xff]   ;;  %v1009_v9 = vld [vmem:[%s1071_s23 + $0x50] sm:$0xff]  }
  0x12   : > { %968 = vmatprep.mubr.msk.bf16.mxu1 %vm292_vm0, %v1005_v5  ;;  %v1010_v10 = vld [vmem:[%s1071_s23 + $0x18] sm:$0xff]   ;;  %v1012_v12 = vld [vmem:[%s1071_s23 + $0x20] sm:$0xff]   ;;  %v1014_v14 = vld [vmem:[%s1071_s23 + $0x28] sm:$0xff]  }
  0x13   : > { %951 = vmatpush3.bf16.msra.mxu0 %v1003_v3  ;;  %991 = vmatpush3.bf16.msra.mxu1 %v1003_v3  ;;  %v1011_v11 = vld [vmem:[%s1071_s23 + $0x58] sm:$0xff]   ;;  %v1013_v13 = vld [vmem:[%s1071_s23 + $0x60] sm:$0xff]   ;;  %v1015_v15 = vld [vmem:[%s1071_s23 + $0x68] sm:$0xff]  }
  0x14   : > { %v1016_v16 = vld [vmem:[%s1071_s23 + $0x30] sm:$0xff]   ;;  %v1018_v18 = vld [vmem:[%s1071_s23 + $0x38] sm:$0xff]  }
  0x15   : > { %v1017_v17 = vld [vmem:[%s1071_s23 + $0x70] sm:$0xff]   ;;  %v1019_v19 = vld [vmem:[%s1071_s23 + $0x78] sm:$0xff]  }
  0x16   : > { %953 = vmatmul.mubr.msk.bf16.vlgmr.msra.gmra.mrb[0].mxu0 %vm292_vm0, %v1006_v6  ;;  %969 = vmatmul.mubr.msk.bf16.vlgmr.msra.gmra.mrb[0].mxu1 %vm292_vm0, %v1007_v7 }
  0x17   : > { %956 = vmatprep.mubr.msk.bf16.mxu0 %vm292_vm0, %v1008_v8  ;;  %972 = vmatprep.mubr.msk.bf16.mxu1 %vm292_vm0, %v1009_v9 }
  0x1e   : > { %957 = vmatmul.mubr.msk.bf16.gmra.mrb[4].mxu0 %vm292_vm0, %v1010_v10  ;;  %973 = vmatmul.mubr.msk.bf16.gmra.mrb[4].mxu1 %vm292_vm0, %v1011_v11 }
  0x1f   : > { %960 = vmatprep.mubr.msk.bf16.mxu0 %vm292_vm0, %v1012_v12  ;;  %976 = vmatprep.mubr.msk.bf16.mxu1 %vm292_vm0, %v1013_v13 }
  0x26   : > { %961 = vmatmul.mubr.msk.bf16.gmra.mrb[8].mxu0 %vm292_vm0, %v1014_v14  ;;  %977 = vmatmul.mubr.msk.bf16.gmra.mrb[8].mxu1 %vm292_vm0, %v1015_v15 }
  0x27   : > { %964 = vmatprep.mubr.msk.bf16.mxu0 %vm292_vm0, %v1016_v16  ;;  %980 = vmatprep.mubr.msk.bf16.mxu1 %vm292_vm0, %v1017_v17 }
  0x2e   : > { %965 = vmatmul.mubr.msk.bf16.gmra.mrb[12].mxu0 %vm292_vm0, %v1018_v18  ;;  %981 = vmatmul.mubr.msk.bf16.gmra.mrb[12].mxu1 %vm292_vm0, %v1019_v19 }
  0xe9   : > { %v954_v20 = vpop.f32.mrb[0].mxu0  ;;  %v970_v21 = vpop.f32.mrb[0].mxu1 }
  0xea   : > { %v375_v22 = vpop.f32.mrb[1].mxu0  ;;  %v439_v23 = vpop.f32.mrb[1].mxu1 }
  0xeb   : > { %v955_v24 = vpop.f32.mrb[2].mxu0  ;;  %v971_v25 = vpop.f32.mrb[2].mxu1 }
  0xec   : > { %v837_v26 = vpack.c.bf16 %v955_v24, %v954_v20  ;;  %v877_v27 = vpack.c.bf16 %v971_v25, %v970_v21  ;;  %v378_v28 = vpop.f32.mrb[3].mxu0  ;;  %v442_v29 = vpop.f32.mrb[3].mxu1 }
  0xed   : > { %v832_v30 = vpack.c.bf16 %v378_v28, %v375_v22  ;;  %v872_v31 = vpack.c.bf16 %v442_v29, %v439_v23 }
  0xee   : > { %909 = vst [vmem:[%s1110_s26 + $0x8] sm:$0xff] %v837_v26   ;;  %917 = vst [vmem:[%s1110_s26 + $0x48] sm:$0xff] %v877_v27  }
  0xef   : > { %833 = vst [vmem:[%s1110_s26] sm:$0xff] %v832_v30   ;;  %916 = vst [vmem:[%s1110_s26 + $0x40] sm:$0xff] %v872_v31  }
  0xf1   : > { %v958_v32 = vpop.f32.mrb[4].mxu0  ;;  %v974_v33 = vpop.f32.mrb[4].mxu1 }
  0xf2   : > { %v391_v34 = vpop.f32.mrb[5].mxu0  ;;  %v455_v35 = vpop.f32.mrb[5].mxu1 }
  0xf3   : > { %v959_v36 = vpop.f32.mrb[6].mxu0  ;;  %v975_v37 = vpop.f32.mrb[6].mxu1 }
  0xf4   : > { %v847_v38 = vpack.c.bf16 %v959_v36, %v958_v32  ;;  %v887_v39 = vpack.c.bf16 %v975_v37, %v974_v33  ;;  %v394_v40 = vpop.f32.mrb[7].mxu0  ;;  %v458_v41 = vpop.f32.mrb[7].mxu1 }
  0xf5   : > { %v842_v42 = vpack.c.bf16 %v394_v40, %v391_v34  ;;  %v882_v43 = vpack.c.bf16 %v458_v41, %v455_v35 }
  0xf6   : > { %911 = vst [vmem:[%s1110_s26 + $0x18] sm:$0xff] %v847_v38   ;;  %919 = vst [vmem:[%s1110_s26 + $0x58] sm:$0xff] %v887_v39  }
  0xf7   : > { %910 = vst [vmem:[%s1110_s26 + $0x10] sm:$0xff] %v842_v42   ;;  %918 = vst [vmem:[%s1110_s26 + $0x50] sm:$0xff] %v882_v43  }
  0xf9   : > { %v962_v44 = vpop.f32.mrb[8].mxu0  ;;  %v978_v45 = vpop.f32.mrb[8].mxu1 }
  0xfa   : > { %v407_v46 = vpop.f32.mrb[9].mxu0  ;;  %v471_v47 = vpop.f32.mrb[9].mxu1 }
  0xfb   : > { %v963_v48 = vpop.f32.mrb[10].mxu0  ;;  %v979_v49 = vpop.f32.mrb[10].mxu1 }
  0xfc   : > { %v857_v50 = vpack.c.bf16 %v963_v48, %v962_v44  ;;  %v897_v51 = vpack.c.bf16 %v979_v49, %v978_v45  ;;  %v410_v52 = vpop.f32.mrb[11].mxu0  ;;  %v474_v53 = vpop.f32.mrb[11].mxu1 }
  0xfd   : > { %v852_v54 = vpack.c.bf16 %v410_v52, %v407_v46  ;;  %v892_v55 = vpack.c.bf16 %v474_v53, %v471_v47 }
  0xfe   : > { %913 = vst [vmem:[%s1110_s26 + $0x28] sm:$0xff] %v857_v50   ;;  %921 = vst [vmem:[%s1110_s26 + $0x68] sm:$0xff] %v897_v51  }
  0xff   : > { %912 = vst [vmem:[%s1110_s26 + $0x20] sm:$0xff] %v852_v54   ;;  %920 = vst [vmem:[%s1110_s26 + $0x60] sm:$0xff] %v892_v55  }
 0x101   : > { %v966_v56 = vpop.f32.mrb[12].mxu0  ;;  %v982_v57 = vpop.f32.mrb[12].mxu1 }
 0x102   : > { %v423_v58 = vpop.f32.mrb[13].mxu0  ;;  %v487_v59 = vpop.f32.mrb[13].mxu1 }
 0x103   : > { %v967_v60 = vpop.f32.mrb[14].mxu0  ;;  %v983_v61 = vpop.f32.mrb[14].mxu1 }
 0x104   : > { %v867_v62 = vpack.c.bf16 %v967_v60, %v966_v56  ;;  %v907_v63 = vpack.c.bf16 %v983_v61, %v982_v57  ;;  %v426_v0 = vpop.f32.mrb[15].mxu0  ;;  %v490_v1 = vpop.f32.mrb[15].mxu1 }
 0x105   : > { %v862_v2 = vpack.c.bf16 %v426_v0, %v423_v58  ;;  %v902_v3 = vpack.c.bf16 %v490_v1, %v487_v59 }
 0x106   : > { %915 = vst [vmem:[%s1110_s26 + $0x38] sm:$0xff] %v867_v62   ;;  %923 = vst [vmem:[%s1110_s26 + $0x78] sm:$0xff] %v907_v63  }
 0x107   : > { %914 = vst [vmem:[%s1110_s26 + $0x30] sm:$0xff] %v862_v2   ;;  %922 = vst [vmem:[%s1110_s26 + $0x70] sm:$0xff] %v902_v3  }
 0x108 PF: > { %s12_s9 = sadd.s32 1, %s1026_s9  }
 0x109   : > { %p9_p4 = scmp.ge.s32.totalorder %s12_s9, 4  }
 0x10b   :  { %11 = sbr.rel (!%p9_p4) target bundleno = 1 (0x1), region = 58 }

// kernel: gcn_model_forward.6
= control target key start
LH: loop header
LB: loop body
LE: loop exit
PB: predicated region body
PF: predicated region fallthrough
CT: control target
= control target key end

     0   :  { %s1054_s9 = smov 0   ;;  %s1138_s0 = inlined_call_operand.vmem [shape: bf16[512,128], index: 0, kind: input, shape index: {}]   ;;  %s1139_s1 = inlined_call_operand.vmem [shape: bf16[128,128], index: 1, kind: input, shape index: {}]   ;;  %s1140_s2 = inlined_call_operand.vmem [shape: bf16[512,128], index: 2, kind: output, shape index: {}]  }
   0x1 LB: > { %s717_s10 = sadd.s32 4294967295, %s1037_s9   ;;  %p721_p0 = scmp.ge.s32.totalorder %s1037_s9, 1  ;;  %s1037_s9 = sphi %s1054_s9, %s12_s9  }
   0x2   : > { %p113_p1 = scmp.lt.s32.totalorder %s1037_s9, 3 }
   0x4   : > { %p114_p2 = pnand %p721_p0, %p113_p1 }
   0x5   : > { %v1007_v0 = vld [vmem:[%s1139_s1] sm:$0xff] (!%p114_p2)   ;;  %s722_s13 = sshll.u32 (!%p114_p2), %s717_s10, 5  ;;  %v1008_v1 = vld [vmem:[%s1139_s1 + $0x8] sm:$0xff] (!%p114_p2)   ;;  %v1009_v2 = vld [vmem:[%s1139_s1 + $0x10] sm:$0xff] (!%p114_p2)  }
   0x6   : > { %117 = sbr.rel (%p114_p2) target bundleno = 280 (0x118), region = 28  ;;  %p136_p3 = scmp.lt.s32.totalorder (!%p114_p2), %s722_s13, 63  ;;  %935 = vmatprep.subr.bf16.mxu0 (!%p114_p2), %v1007_v0  ;;  %983 = vmatprep.subr.bf16.mxu1 (!%p114_p2), %v1007_v0  ;;  %v1010_v3 = vld [vmem:[%s1139_s1 + $0x18] sm:$0xff] (!%p114_p2)   ;;  %v1011_v6 = vld [vmem:[%s1139_s1 + $0x20] sm:$0xff] (!%p114_p2)   ;;  %v1012_v7 = vld [vmem:[%s1139_s1 + $0x28] sm:$0xff] (!%p114_p2)  }
   0x7   : > { %936 = vmatpush3.bf16.msra.mxu0 (!%p114_p2), %v1007_v0  ;;  %991 = vmatpush3.bf16.msra.mxu1 (!%p114_p2), %v1007_v0  ;;  %v1013_v8 = vld [vmem:[%s1139_s1 + $0x30] sm:$0xff] (!%p114_p2)   ;;  %v1014_v9 = vld [vmem:[%s1139_s1 + $0x38] sm:$0xff] (!%p114_p2)  }
   0x8   : > { %937 = vmatprep.subr.bf16.mxu0 (!%p114_p2), %v1008_v1  ;;  %984 = vmatprep.subr.bf16.mxu1 (!%p114_p2), %v1008_v1 }
   0xb   : > { %938 = vmatpush3.bf16.msra.mxu0 (!%p114_p2), %v1008_v1  ;;  %992 = vmatpush3.bf16.msra.mxu1 (!%p114_p2), %v1008_v1 }
   0xc   : > { %939 = vmatprep.subr.bf16.mxu0 (!%p114_p2), %v1009_v2  ;;  %985 = vmatprep.subr.bf16.mxu1 (!%p114_p2), %v1009_v2 }
   0xd   : > { %s1142_s13 = smov (!%p136_p3, %s722_s13), 63 }
   0xe   : > { %s723_s18 = sshll.u32 %s1142_s13, 2 }
   0xf   : > { %s1079_s21 = scalar_lea.vmem %s1138_s0, %s723_s18  ;;  %940 = vmatpush3.bf16.msra.mxu0 %v1009_v2  ;;  %993 = vmatpush3.bf16.msra.mxu1 %v1009_v2  ;;  %s1117_s6 = scalar_lea.vmem %s1140_s2, %s723_s18 }
  0x10   : > { %v1015_v4 = vld [vmem:[%s1079_s21] sm:$0xff]   ;;  %941 = vmatprep.subr.bf16.mxu0 %v1010_v3  ;;  %986 = vmatprep.subr.bf16.mxu1 %v1010_v3  ;;  %v1017_v10 = vld [vmem:[%s1079_s21 + $0x8] sm:$0xff]   ;;  %v1019_v12 = vld [vmem:[%s1079_s21 + $0x10] sm:$0xff]  }
  0x11   : > { %v1016_v5 = vld [vmem:[%s1079_s21 + $0x40] sm:$0xff]   ;;  %951 = vmatprep.mubr.bf16.mxu0 %v1015_v4  ;;  %v1018_v11 = vld [vmem:[%s1079_s21 + $0x48] sm:$0xff]   ;;  %v1020_v13 = vld [vmem:[%s1079_s21 + $0x50] sm:$0xff]  }
  0x12   : > { %967 = vmatprep.mubr.bf16.mxu1 %v1016_v5  ;;  %v1021_v14 = vld [vmem:[%s1079_s21 + $0x18] sm:$0xff]   ;;  %v1023_v16 = vld [vmem:[%s1079_s21 + $0x20] sm:$0xff]   ;;  %v1025_v18 = vld [vmem:[%s1079_s21 + $0x28] sm:$0xff]  }
  0x13   : > { %942 = vmatpush3.bf16.msra.mxu0 %v1010_v3  ;;  %994 = vmatpush3.bf16.msra.mxu1 %v1010_v3  ;;  %v1022_v15 = vld [vmem:[%s1079_s21 + $0x58] sm:$0xff]   ;;  %v1024_v17 = vld [vmem:[%s1079_s21 + $0x60] sm:$0xff]   ;;  %v1026_v19 = vld [vmem:[%s1079_s21 + $0x68] sm:$0xff]  }
  0x14   : > { %943 = vmatprep.subr.bf16.mxu0 %v1011_v6  ;;  %987 = vmatprep.subr.bf16.mxu1 %v1011_v6  ;;  %v1027_v20 = vld [vmem:[%s1079_s21 + $0x30] sm:$0xff]   ;;  %v1029_v22 = vld [vmem:[%s1079_s21 + $0x38] sm:$0xff]  }
  0x15   : > { %v1028_v21 = vld [vmem:[%s1079_s21 + $0x70] sm:$0xff]   ;;  %v1030_v23 = vld [vmem:[%s1079_s21 + $0x78] sm:$0xff]  }
  0x17   : > { %944 = vmatpush3.bf16.msra.mxu0 %v1011_v6  ;;  %995 = vmatpush3.bf16.msra.mxu1 %v1011_v6 }
  0x18   : > { %945 = vmatprep.subr.bf16.mxu0 %v1012_v7  ;;  %988 = vmatprep.subr.bf16.mxu1 %v1012_v7 }
  0x1b   : > { %946 = vmatpush3.bf16.msra.mxu0 %v1012_v7  ;;  %996 = vmatpush3.bf16.msra.mxu1 %v1012_v7 }
  0x1c   : > { %947 = vmatprep.subr.bf16.mxu0 %v1013_v8  ;;  %989 = vmatprep.subr.bf16.mxu1 %v1013_v8 }
  0x1f   : > { %948 = vmatpush3.bf16.msra.mxu0 %v1013_v8  ;;  %997 = vmatpush3.bf16.msra.mxu1 %v1013_v8 }
  0x20   : > { %949 = vmatprep.subr.bf16.mxu0 %v1014_v9  ;;  %990 = vmatprep.subr.bf16.mxu1 %v1014_v9 }
  0x23   : > { %950 = vmatpush3.bf16.msra.mxu0 %v1014_v9  ;;  %998 = vmatpush3.bf16.msra.mxu1 %v1014_v9 }
  0x26   : > { %952 = vmatmul.mubr.bf16.vlgmr.msra.gmra.mrb[0].mxu0 %v1017_v10  ;;  %968 = vmatmul.mubr.bf16.vlgmr.msra.gmra.mrb[0].mxu1 %v1018_v11 }
  0x27   : > { %955 = vmatprep.mubr.bf16.mxu0 %v1019_v12  ;;  %971 = vmatprep.mubr.bf16.mxu1 %v1020_v13 }
  0x2e   : > { %956 = vmatmul.mubr.bf16.gmra.mrb[4].mxu0 %v1021_v14  ;;  %972 = vmatmul.mubr.bf16.gmra.mrb[4].mxu1 %v1022_v15 }
  0x2f   : > { %959 = vmatprep.mubr.bf16.mxu0 %v1023_v16  ;;  %975 = vmatprep.mubr.bf16.mxu1 %v1024_v17 }
  0x36   : > { %960 = vmatmul.mubr.bf16.gmra.mrb[8].mxu0 %v1025_v18  ;;  %976 = vmatmul.mubr.bf16.gmra.mrb[8].mxu1 %v1026_v19 }
  0x37   : > { %963 = vmatprep.mubr.bf16.mxu0 %v1027_v20  ;;  %979 = vmatprep.mubr.bf16.mxu1 %v1028_v21 }
  0x3e   : > { %964 = vmatmul.mubr.bf16.gmra.mrb[12].mxu0 %v1029_v22  ;;  %980 = vmatmul.mubr.bf16.gmra.mrb[12].mxu1 %v1030_v23 }
  0xf9   : > { %v953_v24 = vpop.f32.mrb[0].mxu0  ;;  %v969_v25 = vpop.f32.mrb[0].mxu1 }
  0xfa   : > { %v374_v26 = vpop.f32.mrb[1].mxu0  ;;  %v438_v27 = vpop.f32.mrb[1].mxu1 }
  0xfb   : > { %v954_v28 = vpop.f32.mrb[2].mxu0  ;;  %v970_v29 = vpop.f32.mrb[2].mxu1 }
  0xfc   : > { %v824_v30 = vpack.c.bf16 %v954_v28, %v953_v24  ;;  %v864_v31 = vpack.c.bf16 %v970_v29, %v969_v25  ;;  %v377_v32 = vpop.f32.mrb[3].mxu0  ;;  %v441_v33 = vpop.f32.mrb[3].mxu1 }
  0xfd   : > { %v819_v34 = vpack.c.bf16 %v377_v32, %v374_v26  ;;  %v859_v35 = vpack.c.bf16 %v441_v33, %v438_v27 }
  0xfe   : > { %896 = vst [vmem:[%s1117_s6 + $0x8] sm:$0xff] %v824_v30   ;;  %904 = vst [vmem:[%s1117_s6 + $0x48] sm:$0xff] %v864_v31  }
  0xff   : > { %820 = vst [vmem:[%s1117_s6] sm:$0xff] %v819_v34   ;;  %903 = vst [vmem:[%s1117_s6 + $0x40] sm:$0xff] %v859_v35  }
 0x101   : > { %v957_v36 = vpop.f32.mrb[4].mxu0  ;;  %v973_v37 = vpop.f32.mrb[4].mxu1 }
 0x102   : > { %v390_v38 = vpop.f32.mrb[5].mxu0  ;;  %v454_v39 = vpop.f32.mrb[5].mxu1 }
 0x103   : > { %v958_v40 = vpop.f32.mrb[6].mxu0  ;;  %v974_v41 = vpop.f32.mrb[6].mxu1 }
 0x104   : > { %v834_v42 = vpack.c.bf16 %v958_v40, %v957_v36  ;;  %v874_v43 = vpack.c.bf16 %v974_v41, %v973_v37  ;;  %v393_v44 = vpop.f32.mrb[7].mxu0  ;;  %v457_v45 = vpop.f32.mrb[7].mxu1 }
 0x105   : > { %v829_v46 = vpack.c.bf16 %v393_v44, %v390_v38  ;;  %v869_v47 = vpack.c.bf16 %v457_v45, %v454_v39 }
 0x106   : > { %898 = vst [vmem:[%s1117_s6 + $0x18] sm:$0xff] %v834_v42   ;;  %906 = vst [vmem:[%s1117_s6 + $0x58] sm:$0xff] %v874_v43  }
 0x107   : > { %897 = vst [vmem:[%s1117_s6 + $0x10] sm:$0xff] %v829_v46   ;;  %905 = vst [vmem:[%s1117_s6 + $0x50] sm:$0xff] %v869_v47  }
 0x109   : > { %v961_v48 = vpop.f32.mrb[8].mxu0  ;;  %v977_v49 = vpop.f32.mrb[8].mxu1 }
 0x10a   : > { %v406_v50 = vpop.f32.mrb[9].mxu0  ;;  %v470_v51 = vpop.f32.mrb[9].mxu1 }
 0x10b   : > { %v962_v52 = vpop.f32.mrb[10].mxu0  ;;  %v978_v53 = vpop.f32.mrb[10].mxu1 }
 0x10c   : > { %v844_v54 = vpack.c.bf16 %v962_v52, %v961_v48  ;;  %v884_v55 = vpack.c.bf16 %v978_v53, %v977_v49  ;;  %v409_v56 = vpop.f32.mrb[11].mxu0  ;;  %v473_v57 = vpop.f32.mrb[11].mxu1 }
 0x10d   : > { %v839_v58 = vpack.c.bf16 %v409_v56, %v406_v50  ;;  %v879_v59 = vpack.c.bf16 %v473_v57, %v470_v51 }
 0x10e   : > { %900 = vst [vmem:[%s1117_s6 + $0x28] sm:$0xff] %v844_v54   ;;  %908 = vst [vmem:[%s1117_s6 + $0x68] sm:$0xff] %v884_v55  }
 0x10f   : > { %899 = vst [vmem:[%s1117_s6 + $0x20] sm:$0xff] %v839_v58   ;;  %907 = vst [vmem:[%s1117_s6 + $0x60] sm:$0xff] %v879_v59  }
 0x111   : > { %v965_v60 = vpop.f32.mrb[12].mxu0  ;;  %v981_v61 = vpop.f32.mrb[12].mxu1 }
 0x112   : > { %v422_v62 = vpop.f32.mrb[13].mxu0  ;;  %v486_v63 = vpop.f32.mrb[13].mxu1 }
 0x113   : > { %v966_v0 = vpop.f32.mrb[14].mxu0  ;;  %v982_v1 = vpop.f32.mrb[14].mxu1 }
 0x114   : > { %v854_v2 = vpack.c.bf16 %v966_v0, %v965_v60  ;;  %v894_v3 = vpack.c.bf16 %v982_v1, %v981_v61  ;;  %v425_v4 = vpop.f32.mrb[15].mxu0  ;;  %v489_v5 = vpop.f32.mrb[15].mxu1 }
 0x115   : > { %v849_v6 = vpack.c.bf16 %v425_v4, %v422_v62  ;;  %v889_v7 = vpack.c.bf16 %v489_v5, %v486_v63 }
 0x116   : > { %902 = vst [vmem:[%s1117_s6 + $0x38] sm:$0xff] %v854_v2   ;;  %910 = vst [vmem:[%s1117_s6 + $0x78] sm:$0xff] %v894_v3  }
 0x117   : > { %901 = vst [vmem:[%s1117_s6 + $0x30] sm:$0xff] %v849_v6   ;;  %909 = vst [vmem:[%s1117_s6 + $0x70] sm:$0xff] %v889_v7  }
 0x118 PF: > { %s12_s9 = sadd.s32 1, %s1037_s9  }
 0x119   : > { %p9_p4 = scmp.ge.s32.totalorder %s12_s9, 4  }
 0x11b   :  { %11 = sbr.rel (!%p9_p4) target bundleno = 1 (0x1), region = 58 }

// kernel: gcn_model_forward.5
= control target key start
LH: loop header
LB: loop body
LE: loop exit
PB: predicated region body
PF: predicated region fallthrough
CT: control target
= control target key end

     0   :  { %s1537_s9 = smov 0   ;;  %s1539_s10 = smov 0   ;;  %s1785_s0 = inlined_call_operand.vmem [shape: bf16[512,512], index: 0, kind: input, shape index: {}]   ;;  %s1786_s1 = inlined_call_operand.vmem [shape: bf16[512,128], index: 1, kind: input, shape index: {}]   ;;  %s1787_s2 = inlined_call_operand.vmem [shape: f32[512,128], index: 2, kind: output, shape index: {}]  }
   0x1   :  { %s1541_s11 = smov 0   ;;  %s1543_s12 = smov 0  }
   0x2   :  { %s1545_s13 = smov 0   ;;  %s1547_s14 = smov 0  }
   0x3   :  { %s1549_s15 = smov 0  }
   0x4 LB: > { %s21_s16 = sadd.s32 1, %s1511_s13  ;;  %s24_s17 = sadd.s32 1, %s1515_s14  ;;  %s1519_s15 = sphi %s1549_s15, %s12_s15   ;;  %s1515_s14 = sphi %s1547_s14, %s1793_s14   ;;  %s1511_s13 = sphi %s1545_s13, %s1792_s13   ;;  %s1507_s12 = sphi %s1543_s12, %s1791_s12   ;;  %s1503_s11 = sphi %s1541_s11, %s1790_s11   ;;  %s1499_s10 = sphi %s1539_s10, %s1789_s10   ;;  %s1495_s9 = sphi %s1537_s9, %s1788_s9  }
   0x5   : > { %p22_p0 = scmp.ge.s32.totalorder %s21_s16, 2  ;;  %p40_p1 = scmp.ne.s32.totalorder %s1499_s10, %s1495_s9 }
   0x6   : > { %p41_p2 = scmp.eq.s32.totalorder %s1519_s15, 0  ;;  %s33_s21 = sadd.s32 1, %s1499_s10 }
   0x7   : > { %s1795_s16 = smov (%p22_p0, %s21_s16), 0  ;;  %s1797_s17 = smov (!%p22_p0, %s24_s17), %s1515_s14 }
   0x8   : > { %p42_p3 = por %p41_p2, %p40_p1  ;;  %p26_p4 = scmp.ge.s32.totalorder %s1797_s17, 2 }
   0x9   : > { %s29_s18 = ssub.s32 %s1511_s13, %s1795_s16  ;;  %p1151_p6 = scmp.ge.s32.totalorder %s1519_s15, 4 }
   0xa   : > { %s1799_s17 = smov (%p26_p4, %s1797_s17), 0 }
   0xb   : > { %s28_s19 = ssub.s32 %s1515_s14, %s1799_s17  ;;  %118 = sbr.rel (%p1151_p6) target bundleno = 41 (0x29), region = 16 }
   0xc   : > { %s30_s20 = sor.u32 %s29_s18, %s28_s19 }
   0xd   : > { %p31_p5 = scmp.eq.s32.totalorder %s30_s20, 0 }
   0xf   : > { %s1588_s22 = scalar_select %p31_p5, %s1499_s10, %s33_s21  }
  0x12   : > { %121 = sbr.rel (!%p42_p3) target bundleno = 41 (0x29), region = 20  ;;  %s123_s23 = sand.u32 (%p42_p3), 1, %s1499_s10  }
  0x13   : > { %s1154_s24 = sshll.u32 (%p42_p3), %s1511_s13, 1  ;;  %s1152_s25 = sshll.u32 (%p42_p3), %s123_s23, 8 }
  0x14   : > { %s1215_s26 = sshll.u32 (%p42_p3), %s1515_s14, 7  ;;  %s1602_s4 = scalar_lea.vmem (%p42_p3), [#allocation3], %s1152_s25 }
  0x15   : > { %s129_s27 = sadd.s32 (%p42_p3), %s1215_s26, %s1154_s24 }
  0x16   : > { %s1156_s28 = sshll.u32 (%p42_p3), %s129_s27, 2 }
  0x17   : > { %s1597_s3 = scalar_lea.vmem (%p42_p3), %s1785_s0, %s1156_s28 }
  0x18   : > { %v221_v0 = vld [vmem:[%s1597_s3] sm:$0xff] (%p42_p3)  ;;  %v223_v1 = vld [vmem:[%s1597_s3 + $0x10] sm:$0xff] (%p42_p3) }
  0x19   : > { %v225_v2 = vld [vmem:[%s1597_s3 + $0x20] sm:$0xff]  ;;  %222 = vst [vmem:[%s1602_s4] sm:$0xff] %v221_v0  ;;  %224 = vst [vmem:[%s1602_s4 + $0x8] sm:$0xff] %v223_v1  ;;  %v227_v3 = vld [vmem:[%s1597_s3 + $0x30] sm:$0xff] }
  0x1a   : > { %226 = vst [vmem:[%s1602_s4 + $0x10] sm:$0xff] %v225_v2  ;;  %v229_v4 = vld [vmem:[%s1597_s3 + $0x40] sm:$0xff]  ;;  %v231_v5 = vld [vmem:[%s1597_s3 + $0x50] sm:$0xff]  ;;  %228 = vst [vmem:[%s1602_s4 + $0x18] sm:$0xff] %v227_v3 }
  0x1b   : > { %230 = vst [vmem:[%s1602_s4 + $0x20] sm:$0xff] %v229_v4  ;;  %232 = vst [vmem:[%s1602_s4 + $0x28] sm:$0xff] %v231_v5  ;;  %v233_v6 = vld [vmem:[%s1597_s3 + $0x60] sm:$0xff]  ;;  %v235_v7 = vld [vmem:[%s1597_s3 + $0x70] sm:$0xff] }
  0x1c   : > { %v237_v8 = vld [vmem:[%s1597_s3 + $0x80] sm:$0xff]  ;;  %234 = vst [vmem:[%s1602_s4 + $0x30] sm:$0xff] %v233_v6  ;;  %236 = vst [vmem:[%s1602_s4 + $0x38] sm:$0xff] %v235_v7  ;;  %v239_v9 = vld [vmem:[%s1597_s3 + $0x90] sm:$0xff] }
  0x1d   : > { %238 = vst [vmem:[%s1602_s4 + $0x40] sm:$0xff] %v237_v8  ;;  %v241_v10 = vld [vmem:[%s1597_s3 + $0xa0] sm:$0xff]  ;;  %v243_v11 = vld [vmem:[%s1597_s3 + $0xb0] sm:$0xff]  ;;  %240 = vst [vmem:[%s1602_s4 + $0x48] sm:$0xff] %v239_v9 }
  0x1e   : > { %242 = vst [vmem:[%s1602_s4 + $0x50] sm:$0xff] %v241_v10  ;;  %244 = vst [vmem:[%s1602_s4 + $0x58] sm:$0xff] %v243_v11  ;;  %v245_v12 = vld [vmem:[%s1597_s3 + $0xc0] sm:$0xff]  ;;  %v247_v13 = vld [vmem:[%s1597_s3 + $0xd0] sm:$0xff] }
  0x1f   : > { %v249_v14 = vld [vmem:[%s1597_s3 + $0xe0] sm:$0xff]  ;;  %246 = vst [vmem:[%s1602_s4 + $0x60] sm:$0xff] %v245_v12  ;;  %248 = vst [vmem:[%s1602_s4 + $0x68] sm:$0xff] %v247_v13  ;;  %v251_v15 = vld [vmem:[%s1597_s3 + $0xf0] sm:$0xff] }
  0x20   : > { %250 = vst [vmem:[%s1602_s4 + $0x70] sm:$0xff] %v249_v14  ;;  %v253_v16 = vld [vmem:[%s1597_s3 + $0x100] sm:$0xff]  ;;  %v255_v17 = vld [vmem:[%s1597_s3 + $0x110] sm:$0xff]  ;;  %252 = vst [vmem:[%s1602_s4 + $0x78] sm:$0xff] %v251_v15 }
  0x21   : > { %254 = vst [vmem:[%s1602_s4 + $0x80] sm:$0xff] %v253_v16  ;;  %256 = vst [vmem:[%s1602_s4 + $0x88] sm:$0xff] %v255_v17  ;;  %v257_v18 = vld [vmem:[%s1597_s3 + $0x120] sm:$0xff]  ;;  %v259_v19 = vld [vmem:[%s1597_s3 + $0x130] sm:$0xff] }
  0x22   : > { %v261_v20 = vld [vmem:[%s1597_s3 + $0x140] sm:$0xff]  ;;  %258 = vst [vmem:[%s1602_s4 + $0x90] sm:$0xff] %v257_v18  ;;  %260 = vst [vmem:[%s1602_s4 + $0x98] sm:$0xff] %v259_v19  ;;  %v263_v21 = vld [vmem:[%s1597_s3 + $0x150] sm:$0xff] }
  0x23   : > { %262 = vst [vmem:[%s1602_s4 + $0xa0] sm:$0xff] %v261_v20  ;;  %v265_v22 = vld [vmem:[%s1597_s3 + $0x160] sm:$0xff]  ;;  %v267_v23 = vld [vmem:[%s1597_s3 + $0x170] sm:$0xff]  ;;  %264 = vst [vmem:[%s1602_s4 + $0xa8] sm:$0xff] %v263_v21 }
  0x24   : > { %266 = vst [vmem:[%s1602_s4 + $0xb0] sm:$0xff] %v265_v22  ;;  %268 = vst [vmem:[%s1602_s4 + $0xb8] sm:$0xff] %v267_v23  ;;  %v269_v24 = vld [vmem:[%s1597_s3 + $0x180] sm:$0xff]  ;;  %v271_v25 = vld [vmem:[%s1597_s3 + $0x190] sm:$0xff] }
  0x25   : > { %v273_v26 = vld [vmem:[%s1597_s3 + $0x1a0] sm:$0xff]  ;;  %270 = vst [vmem:[%s1602_s4 + $0xc0] sm:$0xff] %v269_v24  ;;  %272 = vst [vmem:[%s1602_s4 + $0xc8] sm:$0xff] %v271_v25  ;;  %v275_v27 = vld [vmem:[%s1597_s3 + $0x1b0] sm:$0xff] }
  0x26   : > { %274 = vst [vmem:[%s1602_s4 + $0xd0] sm:$0xff] %v273_v26  ;;  %v277_v28 = vld [vmem:[%s1597_s3 + $0x1c0] sm:$0xff]  ;;  %v279_v29 = vld [vmem:[%s1597_s3 + $0x1d0] sm:$0xff]  ;;  %276 = vst [vmem:[%s1602_s4 + $0xd8] sm:$0xff] %v275_v27 }
  0x27   : > { %278 = vst [vmem:[%s1602_s4 + $0xe0] sm:$0xff] %v277_v28  ;;  %280 = vst [vmem:[%s1602_s4 + $0xe8] sm:$0xff] %v279_v29  ;;  %v281_v30 = vld [vmem:[%s1597_s3 + $0x1e0] sm:$0xff]  ;;  %v283_v31 = vld [vmem:[%s1597_s3 + $0x1f0] sm:$0xff] }
  0x28   : > { %282 = vst [vmem:[%s1602_s4 + $0xf0] sm:$0xff] %v281_v30  ;;  %284 = vst [vmem:[%s1602_s4 + $0xf8] sm:$0xff] %v283_v31 }
  0x29 PF: > { %p1157_p7 = scmp.ge.s32.totalorder %s1519_s15, 1  ;;  %p298_p8 = scmp.lt.s32.totalorder %s1519_s15, 5 }
  0x2b   : > { %p299_p9 = pnand %p1157_p7, %p298_p8 }
  0x2c   : > { %s305_s5 = sand.u32 (!%p299_p9), 1, %s1495_s9   ;;  %s1159_s6 = sshll.u32 (!%p299_p9), %s1503_s11, 5 }
  0x2d   : > { %302 = sbr.rel (%p299_p9) target bundleno = 390 (0x186), region = 62  ;;  %s1158_s7 = sshll.u32 (!%p299_p9), %s305_s5, 8 }
  0x2e   : > { %p334_p10 = scmp.lt.s32.totalorder (!%p299_p9), %s1159_s6, 63  ;;  %s1161_s8 = sshll.u32 (!%p299_p9), %s1507_s12, 5 }
  0x2f   : > { %p340_p11 = scmp.lt.s32.totalorder (!%p299_p9), %s1161_s8, 63  ;;  %s1680_s9 = scalar_lea.vmem (!%p299_p9), [#allocation3], %s1158_s7 }
  0x30   : > { %p1163_p12 = scmp.ne.s32.totalorder (!%p299_p9), %s1503_s11, 0 }
  0x34   : > { %s1801_s6 = smov (!%p334_p10, %s1159_s6), 63  ;;  %s1803_s8 = smov (!%p340_p11, %s1161_s8), 63 }
  0x35   : > { %s1160_s18 = sshll.u32 %s1801_s6, 2  ;;  %s1162_s23 = sshll.u32 %s1803_s8, 3  ;;  %v1521_v32 = vmov (!%p1163_p12), 0.0  }
  0x36   : > { %s1673_s21 = scalar_lea.vmem %s1786_s1, %s1160_s18  ;;  %s1678_s26 = scalar_lea.vmem %s1787_s2, %s1162_s23  ;;  %350 = vst [vmem:[#allocation2] sm:$0xff] (!%p1163_p12), %v1521_v32  ;;  %351 = vst [vmem:[#allocation2 + $0x8] sm:$0xff] (!%p1163_p12), %v1521_v32 }
  0x37   : > { %349 = sbr.rel (%p1163_p12) target bundleno = 70 (0x46), region = 70  ;;  %352 = vst [vmem:[#allocation2 + $0x10] sm:$0xff] (!%p1163_p12), %v1521_v32  ;;  %353 = vst [vmem:[#allocation2 + $0x18] sm:$0xff] (!%p1163_p12), %v1521_v32 }
  0x38   : > { %354 = vst [vmem:[#allocation2 + $0x20] sm:$0xff] (!%p1163_p12), %v1521_v32  ;;  %355 = vst [vmem:[#allocation2 + $0x28] sm:$0xff] (!%p1163_p12), %v1521_v32 }
  0x39   : > { %356 = vst [vmem:[#allocation2 + $0x30] sm:$0xff] (!%p1163_p12), %v1521_v32  ;;  %357 = vst [vmem:[#allocation2 + $0x38] sm:$0xff] (!%p1163_p12), %v1521_v32 }
  0x3a   : > { %358 = vst [vmem:[#allocation2 + $0x40] sm:$0xff] (!%p1163_p12), %v1521_v32  ;;  %359 = vst [vmem:[#allocation2 + $0x48] sm:$0xff] (!%p1163_p12), %v1521_v32 }
  0x3b   : > { %360 = vst [vmem:[#allocation2 + $0x50] sm:$0xff] (!%p1163_p12), %v1521_v32  ;;  %361 = vst [vmem:[#allocation2 + $0x58] sm:$0xff] (!%p1163_p12), %v1521_v32 }
  0x3c   : > { %362 = vst [vmem:[#allocation2 + $0x60] sm:$0xff] (!%p1163_p12), %v1521_v32  ;;  %363 = vst [vmem:[#allocation2 + $0x68] sm:$0xff] (!%p1163_p12), %v1521_v32 }
  0x3d   : > { %364 = vst [vmem:[#allocation2 + $0x70] sm:$0xff] (!%p1163_p12), %v1521_v32  ;;  %365 = vst [vmem:[#allocation2 + $0x78] sm:$0xff] (!%p1163_p12), %v1521_v32 }
  0x3e   : > { %366 = vst [vmem:[#allocation2 + $0x80] sm:$0xff] %v1521_v32  ;;  %367 = vst [vmem:[#allocation2 + $0x88] sm:$0xff] %v1521_v32 }
  0x3f   : > { %368 = vst [vmem:[#allocation2 + $0x90] sm:$0xff] %v1521_v32  ;;  %369 = vst [vmem:[#allocation2 + $0x98] sm:$0xff] %v1521_v32 }
  0x40   : > { %370 = vst [vmem:[#allocation2 + $0xa0] sm:$0xff] %v1521_v32  ;;  %371 = vst [vmem:[#allocation2 + $0xa8] sm:$0xff] %v1521_v32 }
  0x41   : > { %372 = vst [vmem:[#allocation2 + $0xb0] sm:$0xff] %v1521_v32  ;;  %373 = vst [vmem:[#allocation2 + $0xb8] sm:$0xff] %v1521_v32 }
  0x42   : > { %374 = vst [vmem:[#allocation2 + $0xc0] sm:$0xff] %v1521_v32  ;;  %375 = vst [vmem:[#allocation2 + $0xc8] sm:$0xff] %v1521_v32 }
  0x43   : > { %376 = vst [vmem:[#allocation2 + $0xd0] sm:$0xff] %v1521_v32  ;;  %377 = vst [vmem:[#allocation2 + $0xd8] sm:$0xff] %v1521_v32 }
  0x44   : > { %378 = vst [vmem:[#allocation2 + $0xe0] sm:$0xff] %v1521_v32  ;;  %379 = vst [vmem:[#allocation2 + $0xe8] sm:$0xff] %v1521_v32 }
  0x45   : > { %380 = vst [vmem:[#allocation2 + $0xf0] sm:$0xff] %v1521_v32  ;;  %381 = vst [vmem:[#allocation2 + $0xf8] sm:$0xff] %v1521_v32 }
  0x46 PF: > { %v1401_v33 = vld [vmem:[%s1673_s21 + $0x40] sm:$0xff]   ;;  %v1403_v35 = vld [vmem:[%s1673_s21 + $0x48] sm:$0xff]   ;;  %v1405_v37 = vld [vmem:[%s1673_s21 + $0x50] sm:$0xff]   ;;  %p1212_p13 = scmp.ne.s32.totalorder %s1503_s11, 1 }
  0x47   : > { %v1402_v34 = vld [vmem:[%s1673_s21] sm:$0xff]   ;;  %1216 = vmatprep.subr.bf16.mxu0 %v1401_v33  ;;  %1328 = vmatprep.subr.bf16.mxu1 %v1401_v33  ;;  %v1404_v36 = vld [vmem:[%s1673_s21 + $0x8] sm:$0xff]   ;;  %v1406_v38 = vld [vmem:[%s1673_s21 + $0x10] sm:$0xff]  }
  0x48   : > { %1217 = vmatpush3.bf16.msra.mxu0 %v1402_v34  ;;  %1336 = vmatpush3.bf16.msra.mxu1 %v1402_v34  ;;  %v1407_v39 = vld [vmem:[%s1673_s21 + $0x58] sm:$0xff]   ;;  %v1409_v41 = vld [vmem:[%s1673_s21 + $0x60] sm:$0xff]   ;;  %v1411_v43 = vld [vmem:[%s1673_s21 + $0x68] sm:$0xff]  }
  0x49   : > { %1218 = vmatprep.subr.bf16.mxu0 %v1403_v35  ;;  %1329 = vmatprep.subr.bf16.mxu1 %v1403_v35  ;;  %v1408_v40 = vld [vmem:[%s1673_s21 + $0x18] sm:$0xff]   ;;  %v1410_v42 = vld [vmem:[%s1673_s21 + $0x20] sm:$0xff]   ;;  %v1412_v46 = vld [vmem:[%s1673_s21 + $0x28] sm:$0xff]  }
  0x4a   : > { %v1419_v44 = vld [vmem:[%s1680_s9 + $0x4] ss:$8 sps:$4 sm:$0xff]   ;;  %v1413_v47 = vld [vmem:[%s1673_s21 + $0x70] sm:$0xff]   ;;  %v1415_v49 = vld [vmem:[%s1673_s21 + $0x78] sm:$0xff]  }
  0x4b   : > { %v1422_v45 = vld [vmem:[%s1680_s9 + $0x84] ss:$8 sps:$4 sm:$0xff]   ;;  %766 = vmatprep.mubr.bf16.mxu0 %v1419_v44  ;;  %v1414_v48 = vld [vmem:[%s1673_s21 + $0x30] sm:$0xff]   ;;  %v1416_v50 = vld [vmem:[%s1673_s21 + $0x38] sm:$0xff]  }
  0x4c   : > { %1219 = vmatpush3.bf16.msra.mxu0 %v1404_v36  ;;  %1337 = vmatpush3.bf16.msra.mxu1 %v1404_v36  ;;  %v1417_v51 = vld [vmem:[%s1680_s9] ss:$8 sps:$4 sm:$0xff]   ;;  %v1423_v53 = vld [vmem:[%s1680_s9 + $0x14] ss:$8 sps:$4 sm:$0xff]   ;;  %v1427_v55 = vld [vmem:[%s1680_s9 + $0x10] ss:$8 sps:$4 sm:$0xff]  }
  0x4d   : > { %1220 = vmatprep.subr.bf16.mxu0 %v1405_v37  ;;  %1330 = vmatprep.subr.bf16.mxu1 %v1405_v37  ;;  %v1420_v52 = vld [vmem:[%s1680_s9 + $0x80] ss:$8 sps:$4 sm:$0xff]   ;;  %v1425_v54 = vld [vmem:[%s1680_s9 + $0x94] ss:$8 sps:$4 sm:$0xff]   ;;  %v1428_v56 = vld [vmem:[%s1680_s9 + $0x90] ss:$8 sps:$4 sm:$0xff]  }
  0x4e   : > { %830 = vmatprep.mubr.bf16.mxu1 %v1422_v45  ;;  %v1429_v57 = vld [vmem:[%s1680_s9 + $0x24] ss:$8 sps:$4 sm:$0xff]   ;;  %v1433_v59 = vld [vmem:[%s1680_s9 + $0x20] ss:$8 sps:$4 sm:$0xff]   ;;  %v1435_v61 = vld [vmem:[%s1680_s9 + $0x34] ss:$8 sps:$4 sm:$0xff]  }
  0x4f   : > { %v1431_v58 = vld [vmem:[%s1680_s9 + $0xa4] ss:$8 sps:$4 sm:$0xff]   ;;  %v1434_v60 = vld [vmem:[%s1680_s9 + $0xa0] ss:$8 sps:$4 sm:$0xff]   ;;  %v1437_v62 = vld [vmem:[%s1680_s9 + $0xb4] ss:$8 sps:$4 sm:$0xff]  }
  0x50   : > { %1221 = vmatpush3.bf16.msra.mxu0 %v1406_v38  ;;  %1338 = vmatpush3.bf16.msra.mxu1 %v1406_v38  ;;  %v1439_v63 = vld [vmem:[%s1680_s9 + $0x30] ss:$8 sps:$4 sm:$0xff]   ;;  %v1441_v1 = vld [vmem:[%s1680_s9 + $0x44] ss:$8 sps:$4 sm:$0xff]   ;;  %v1445_v3 = vld [vmem:[%s1680_s9 + $0x40] ss:$8 sps:$4 sm:$0xff]  }
  0x51   : > { %1222 = vmatprep.subr.bf16.mxu0 %v1407_v39  ;;  %1331 = vmatprep.subr.bf16.mxu1 %v1407_v39  ;;  %v1440_v0 = vld [vmem:[%s1680_s9 + $0xb0] ss:$8 sps:$4 sm:$0xff]   ;;  %v1443_v2 = vld [vmem:[%s1680_s9 + $0xc4] ss:$8 sps:$4 sm:$0xff]   ;;  %v1446_v4 = vld [vmem:[%s1680_s9 + $0xc0] ss:$8 sps:$4 sm:$0xff]  }
  0x52   : > { %v1447_v5 = vld [vmem:[%s1680_s9 + $0x54] ss:$8 sps:$4 sm:$0xff]   ;;  %v1451_v7 = vld [vmem:[%s1680_s9 + $0x50] ss:$8 sps:$4 sm:$0xff]   ;;  %v1453_v9 = vld [vmem:[%s1680_s9 + $0x64] ss:$8 sps:$4 sm:$0xff]  }
  0x53   : > { %v1449_v6 = vld [vmem:[%s1680_s9 + $0xd4] ss:$8 sps:$4 sm:$0xff]   ;;  %v1452_v8 = vld [vmem:[%s1680_s9 + $0xd0] ss:$8 sps:$4 sm:$0xff]   ;;  %v1455_v10 = vld [vmem:[%s1680_s9 + $0xe4] ss:$8 sps:$4 sm:$0xff]  }
  0x54   : > { %1223 = vmatpush3.bf16.msra.mxu0 %v1408_v40  ;;  %1339 = vmatpush3.bf16.msra.mxu1 %v1408_v40  ;;  %v1457_v11 = vld [vmem:[%s1680_s9 + $0x60] ss:$8 sps:$4 sm:$0xff]   ;;  %v1459_v13 = vld [vmem:[%s1680_s9 + $0x74] ss:$8 sps:$4 sm:$0xff]   ;;  %v1463_v15 = vld [vmem:[%s1680_s9 + $0x70] ss:$8 sps:$4 sm:$0xff]  }
  0x55   : > { %1224 = vmatprep.subr.bf16.mxu0 %v1409_v41  ;;  %1332 = vmatprep.subr.bf16.mxu1 %v1409_v41  ;;  %v1458_v12 = vld [vmem:[%s1680_s9 + $0xe0] ss:$8 sps:$4 sm:$0xff]   ;;  %v1461_v14 = vld [vmem:[%s1680_s9 + $0xf4] ss:$8 sps:$4 sm:$0xff]   ;;  %v1464_v16 = vld [vmem:[%s1680_s9 + $0xf0] ss:$8 sps:$4 sm:$0xff]  }
  0x56   : > { %v382_v19 = vld [vmem:[#allocation2] sm:$0xff]  ;;  %v383_v27 = vld [vmem:[#allocation2 + $0x8] sm:$0xff]  ;;  %v384_v39 = vld [vmem:[#allocation2 + $0x10] sm:$0xff] }
  0x57   : > { %v398_v21 = vld [vmem:[#allocation2 + $0x80] sm:$0xff]  ;;  %v399_v29 = vld [vmem:[#allocation2 + $0x88] sm:$0xff]  ;;  %v400_v41 = vld [vmem:[#allocation2 + $0x90] sm:$0xff] }
  0x58   : > { %1225 = vmatpush3.bf16.msra.mxu0 %v1410_v42  ;;  %1340 = vmatpush3.bf16.msra.mxu1 %v1410_v42 }
  0x59   : > { %1226 = vmatprep.subr.bf16.mxu0 %v1411_v43  ;;  %1333 = vmatprep.subr.bf16.mxu1 %v1411_v43 }
  0x5c   : > { %1227 = vmatpush3.bf16.msra.mxu0 %v1412_v46  ;;  %1341 = vmatpush3.bf16.msra.mxu1 %v1412_v46 }
  0x5d   : > { %1228 = vmatprep.subr.bf16.mxu0 %v1413_v47  ;;  %1334 = vmatprep.subr.bf16.mxu1 %v1413_v47  ;;  %v385_v47 = vld [vmem:[#allocation2 + $0x18] sm:$0xff] }
  0x60   : > { %1229 = vmatpush3.bf16.msra.mxu0 %v1414_v48  ;;  %1342 = vmatpush3.bf16.msra.mxu1 %v1414_v48 }
  0x61   : > { %1230 = vmatprep.subr.bf16.mxu0 %v1415_v49  ;;  %1335 = vmatprep.subr.bf16.mxu1 %v1415_v49  ;;  %v401_v49 = vld [vmem:[#allocation2 + $0x98] sm:$0xff] }
  0x64   : > { %1231 = vmatpush3.bf16.msra.mxu0 %v1416_v50  ;;  %1343 = vmatpush3.bf16.msra.mxu1 %v1416_v50 }
  0x67   : > { %767 = vmatmul.mubr.bf16.vlgmr.msra.gmra.mrb[0].mxu0 %v1417_v51  ;;  %831 = vmatmul.mubr.bf16.vlgmr.msra.gmra.mrb[0].mxu1 %v1420_v52 }
  0x68   : > { %774 = vmatprep.mubr.bf16.mxu0 %v1423_v53  ;;  %838 = vmatprep.mubr.bf16.mxu1 %v1425_v54 }
  0x6f   : > { %775 = vmatmul.mubr.bf16.gmra.mrb[4].mxu0 %v1427_v55  ;;  %839 = vmatmul.mubr.bf16.gmra.mrb[4].mxu1 %v1428_v56 }
  0x70   : > { %782 = vmatprep.mubr.bf16.mxu0 %v1429_v57  ;;  %846 = vmatprep.mubr.bf16.mxu1 %v1431_v58 }
  0x77   : > { %783 = vmatmul.mubr.bf16.gmra.mrb[8].mxu0 %v1433_v59  ;;  %847 = vmatmul.mubr.bf16.gmra.mrb[8].mxu1 %v1434_v60  ;;  %v386_v59 = vld [vmem:[#allocation2 + $0x20] sm:$0xff] }
  0x78   : > { %790 = vmatprep.mubr.bf16.mxu0 %v1435_v61  ;;  %854 = vmatprep.mubr.bf16.mxu1 %v1437_v62  ;;  %v402_v61 = vld [vmem:[#allocation2 + $0xa0] sm:$0xff] }
  0x7f   : > { %791 = vmatmul.mubr.bf16.gmra.mrb[12].mxu0 %v1439_v63  ;;  %855 = vmatmul.mubr.bf16.gmra.mrb[12].mxu1 %v1440_v0 }
  0x80   : > { %798 = vmatprep.mubr.bf16.mxu0 %v1441_v1  ;;  %862 = vmatprep.mubr.bf16.mxu1 %v1443_v2 }
  0x87   : > { %799 = vmatmul.mubr.bf16.gmra.mrb[16].mxu0 %v1445_v3  ;;  %863 = vmatmul.mubr.bf16.gmra.mrb[16].mxu1 %v1446_v4  ;;  %v387_v3 = vld [vmem:[#allocation2 + $0x28] sm:$0xff] }
  0x88   : > { %806 = vmatprep.mubr.bf16.mxu0 %v1447_v5  ;;  %870 = vmatprep.mubr.bf16.mxu1 %v1449_v6  ;;  %v403_v5 = vld [vmem:[#allocation2 + $0xa8] sm:$0xff] }
  0x8f   : > { %807 = vmatmul.mubr.bf16.gmra.mrb[20].mxu0 %v1451_v7  ;;  %871 = vmatmul.mubr.bf16.gmra.mrb[20].mxu1 %v1452_v8 }
  0x90   : > { %814 = vmatprep.mubr.bf16.mxu0 %v1453_v9  ;;  %878 = vmatprep.mubr.bf16.mxu1 %v1455_v10 }
  0x97   : > { %815 = vmatmul.mubr.bf16.gmra.mrb[24].mxu0 %v1457_v11  ;;  %879 = vmatmul.mubr.bf16.gmra.mrb[24].mxu1 %v1458_v12 }
  0x98   : > { %822 = vmatprep.mubr.bf16.mxu0 %v1459_v13  ;;  %886 = vmatprep.mubr.bf16.mxu1 %v1461_v14 }
  0x9f   : > { %823 = vmatmul.mubr.bf16.gmra.mrb[28].mxu0 %v1463_v15  ;;  %887 = vmatmul.mubr.bf16.gmra.mrb[28].mxu1 %v1464_v16  ;;  %v388_v15 = vld [vmem:[#allocation2 + $0x30] sm:$0xff] }
 0x13a   : > { %v1232_v17 = vpop.f32.mrb[0].mxu0  ;;  %v1280_v18 = vpop.f32.mrb[0].mxu1 }
 0x13b   : > { %v1233_v20 = vpop.f32.mrb[1].mxu0  ;;  %v1281_v22 = vpop.f32.mrb[1].mxu1 }
 0x13c   : > { %v1234_v23 = vadd.f32 %v1233_v20, %v1232_v17  ;;  %v1282_v24 = vadd.f32 %v1281_v22, %v1280_v18  ;;  %v1235_v25 = vpop.f32.mrb[2].mxu0  ;;  %v1283_v26 = vpop.f32.mrb[2].mxu1  ;;  %v404_v17 = vld [vmem:[#allocation2 + $0xb0] sm:$0xff] }
 0x13d   : > { %v1236_v28 = vpop.f32.mrb[3].mxu0  ;;  %v1284_v30 = vpop.f32.mrb[3].mxu1 }
 0x13e   : > { %v895_v31 = vadd.f32 %v1234_v23, %v382_v19  ;;  %v911_v32 = vadd.f32 %v1282_v24, %v398_v21  ;;  %v1237_v33 = vadd.f32 %v1236_v28, %v1235_v25  ;;  %v1285_v34 = vadd.f32 %v1284_v30, %v1283_v26  ;;  %v389_v23 = vld [vmem:[#allocation2 + $0x38] sm:$0xff] }
 0x13f   : > { %v405_v25 = vld [vmem:[#allocation2 + $0xb8] sm:$0xff] }
 0x140   : > { %927 = vst [vmem:[#allocation2] sm:$0xff] %v895_v31  ;;  %943 = vst [vmem:[#allocation2 + $0x80] sm:$0xff] %v911_v32  ;;  %v896_v35 = vadd.f32 %v1237_v33, %v383_v27  ;;  %v912_v36 = vadd.f32 %v1285_v34, %v399_v29 }
 0x142   : > { %928 = vst [vmem:[#allocation2 + $0x8] sm:$0xff] %v896_v35  ;;  %944 = vst [vmem:[#allocation2 + $0x88] sm:$0xff] %v912_v36  ;;  %v1238_v37 = vpop.f32.mrb[4].mxu0  ;;  %v1286_v38 = vpop.f32.mrb[4].mxu1  ;;  %v390_v35 = vld [vmem:[#allocation2 + $0x40] sm:$0xff] }
 0x143   : > { %v1239_v40 = vpop.f32.mrb[5].mxu0  ;;  %v1287_v42 = vpop.f32.mrb[5].mxu1 }
 0x144   : > { %v1240_v43 = vadd.f32 %v1239_v40, %v1238_v37  ;;  %v1288_v44 = vadd.f32 %v1287_v42, %v1286_v38  ;;  %v1241_v45 = vpop.f32.mrb[6].mxu0  ;;  %v1289_v46 = vpop.f32.mrb[6].mxu1  ;;  %v406_v37 = vld [vmem:[#allocation2 + $0xc0] sm:$0xff] }
 0x145   : > { %v1242_v48 = vpop.f32.mrb[7].mxu0  ;;  %v1290_v50 = vpop.f32.mrb[7].mxu1 }
 0x146   : > { %v897_v51 = vadd.f32 %v1240_v43, %v384_v39  ;;  %v913_v52 = vadd.f32 %v1288_v44, %v400_v41  ;;  %v1243_v53 = vadd.f32 %v1242_v48, %v1241_v45  ;;  %v1291_v54 = vadd.f32 %v1290_v50, %v1289_v46  ;;  %v391_v43 = vld [vmem:[#allocation2 + $0x48] sm:$0xff] }
 0x147   : > { %v407_v45 = vld [vmem:[#allocation2 + $0xc8] sm:$0xff] }
 0x148   : > { %929 = vst [vmem:[#allocation2 + $0x10] sm:$0xff] %v897_v51  ;;  %945 = vst [vmem:[#allocation2 + $0x90] sm:$0xff] %v913_v52  ;;  %v898_v55 = vadd.f32 %v1243_v53, %v385_v47  ;;  %v914_v56 = vadd.f32 %v1291_v54, %v401_v49 }
 0x14a   : > { %930 = vst [vmem:[#allocation2 + $0x18] sm:$0xff] %v898_v55  ;;  %946 = vst [vmem:[#allocation2 + $0x98] sm:$0xff] %v914_v56  ;;  %v1244_v57 = vpop.f32.mrb[8].mxu0  ;;  %v1292_v58 = vpop.f32.mrb[8].mxu1  ;;  %v392_v55 = vld [vmem:[#allocation2 + $0x50] sm:$0xff] }
 0x14b   : > { %v1245_v60 = vpop.f32.mrb[9].mxu0  ;;  %v1293_v62 = vpop.f32.mrb[9].mxu1 }
 0x14c   : > { %v1246_v63 = vadd.f32 %v1245_v60, %v1244_v57  ;;  %v1294_v0 = vadd.f32 %v1293_v62, %v1292_v58  ;;  %v1247_v1 = vpop.f32.mrb[10].mxu0  ;;  %v1295_v2 = vpop.f32.mrb[10].mxu1  ;;  %v408_v57 = vld [vmem:[#allocation2 + $0xd0] sm:$0xff] }
 0x14d   : > { %v1248_v4 = vpop.f32.mrb[11].mxu0  ;;  %v1296_v6 = vpop.f32.mrb[11].mxu1 }
 0x14e   : > { %v899_v7 = vadd.f32 %v1246_v63, %v386_v59  ;;  %v915_v8 = vadd.f32 %v1294_v0, %v402_v61  ;;  %v1249_v9 = vadd.f32 %v1248_v4, %v1247_v1  ;;  %v1297_v10 = vadd.f32 %v1296_v6, %v1295_v2  ;;  %v393_v63 = vld [vmem:[#allocation2 + $0x58] sm:$0xff] }
 0x14f   : > { %v409_v1 = vld [vmem:[#allocation2 + $0xd8] sm:$0xff] }
 0x150   : > { %931 = vst [vmem:[#allocation2 + $0x20] sm:$0xff] %v899_v7  ;;  %947 = vst [vmem:[#allocation2 + $0xa0] sm:$0xff] %v915_v8  ;;  %v900_v11 = vadd.f32 %v1249_v9, %v387_v3  ;;  %v916_v12 = vadd.f32 %v1297_v10, %v403_v5 }
 0x152   : > { %932 = vst [vmem:[#allocation2 + $0x28] sm:$0xff] %v900_v11  ;;  %948 = vst [vmem:[#allocation2 + $0xa8] sm:$0xff] %v916_v12  ;;  %v1250_v13 = vpop.f32.mrb[12].mxu0  ;;  %v1298_v14 = vpop.f32.mrb[12].mxu1  ;;  %v394_v11 = vld [vmem:[#allocation2 + $0x60] sm:$0xff] }
 0x153   : > { %v1251_v16 = vpop.f32.mrb[13].mxu0  ;;  %v1299_v18 = vpop.f32.mrb[13].mxu1 }
 0x154   : > { %v1252_v19 = vadd.f32 %v1251_v16, %v1250_v13  ;;  %v1300_v20 = vadd.f32 %v1299_v18, %v1298_v14  ;;  %v1253_v21 = vpop.f32.mrb[14].mxu0  ;;  %v1301_v22 = vpop.f32.mrb[14].mxu1  ;;  %v410_v13 = vld [vmem:[#allocation2 + $0xe0] sm:$0xff] }
 0x155   : > { %v1254_v24 = vpop.f32.mrb[15].mxu0  ;;  %v1302_v26 = vpop.f32.mrb[15].mxu1 }
 0x156   : > { %v901_v27 = vadd.f32 %v1252_v19, %v388_v15  ;;  %v917_v28 = vadd.f32 %v1300_v20, %v404_v17  ;;  %v1255_v29 = vadd.f32 %v1254_v24, %v1253_v21  ;;  %v1303_v30 = vadd.f32 %v1302_v26, %v1301_v22  ;;  %v395_v19 = vld [vmem:[#allocation2 + $0x68] sm:$0xff] }
 0x157   : > { %v411_v21 = vld [vmem:[#allocation2 + $0xe8] sm:$0xff] }
 0x158   : > { %933 = vst [vmem:[#allocation2 + $0x30] sm:$0xff] %v901_v27  ;;  %949 = vst [vmem:[#allocation2 + $0xb0] sm:$0xff] %v917_v28  ;;  %v902_v31 = vadd.f32 %v1255_v29, %v389_v23  ;;  %v918_v32 = vadd.f32 %v1303_v30, %v405_v25 }
 0x15a   : > { %934 = vst [vmem:[#allocation2 + $0x38] sm:$0xff] %v902_v31  ;;  %950 = vst [vmem:[#allocation2 + $0xb8] sm:$0xff] %v918_v32  ;;  %v1256_v33 = vpop.f32.mrb[16].mxu0  ;;  %v1304_v34 = vpop.f32.mrb[16].mxu1  ;;  %v396_v31 = vld [vmem:[#allocation2 + $0x70] sm:$0xff] }
 0x15b   : > { %v1257_v36 = vpop.f32.mrb[17].mxu0  ;;  %v1305_v38 = vpop.f32.mrb[17].mxu1 }
 0x15c   : > { %v1258_v39 = vadd.f32 %v1257_v36, %v1256_v33  ;;  %v1306_v40 = vadd.f32 %v1305_v38, %v1304_v34  ;;  %v1259_v41 = vpop.f32.mrb[18].mxu0  ;;  %v1307_v42 = vpop.f32.mrb[18].mxu1  ;;  %v412_v33 = vld [vmem:[#allocation2 + $0xf0] sm:$0xff] }
 0x15d   : > { %v1260_v44 = vpop.f32.mrb[19].mxu0  ;;  %v1308_v46 = vpop.f32.mrb[19].mxu1 }
 0x15e   : > { %v903_v47 = vadd.f32 %v1258_v39, %v390_v35  ;;  %v919_v48 = vadd.f32 %v1306_v40, %v406_v37  ;;  %v1261_v49 = vadd.f32 %v1260_v44, %v1259_v41  ;;  %v1309_v50 = vadd.f32 %v1308_v46, %v1307_v42  ;;  %v397_v39 = vld [vmem:[#allocation2 + $0x78] sm:$0xff] }
 0x15f   : > { %v413_v41 = vld [vmem:[#allocation2 + $0xf8] sm:$0xff] }
 0x160   : > { %935 = vst [vmem:[#allocation2 + $0x40] sm:$0xff] %v903_v47  ;;  %951 = vst [vmem:[#allocation2 + $0xc0] sm:$0xff] %v919_v48  ;;  %v904_v51 = vadd.f32 %v1261_v49, %v391_v43  ;;  %v920_v52 = vadd.f32 %v1309_v50, %v407_v45  ;;  %v963_v49 = vld [vmem:[#allocation2] sm:$0xff] (!%p1212_p13)  ;;  %v964_v50 = vld [vmem:[#allocation2 + $0x8] sm:$0xff] (!%p1212_p13) }
 0x162   : > { %936 = vst [vmem:[#allocation2 + $0x48] sm:$0xff] %v904_v51  ;;  %952 = vst [vmem:[#allocation2 + $0xc8] sm:$0xff] %v920_v52  ;;  %v1262_v53 = vpop.f32.mrb[20].mxu0  ;;  %v1310_v54 = vpop.f32.mrb[20].mxu1  ;;  %v965_v51 = vld [vmem:[#allocation2 + $0x10] sm:$0xff] (!%p1212_p13)  ;;  %v995_v52 = vmax.f32 (!%p1212_p13), %v963_v49, 0.0 }
 0x163   : > { %v1263_v56 = vpop.f32.mrb[21].mxu0  ;;  %v1311_v58 = vpop.f32.mrb[21].mxu1 }
 0x164   : > { %v1264_v59 = vadd.f32 %v1263_v56, %v1262_v53  ;;  %v1312_v60 = vadd.f32 %v1311_v58, %v1310_v54  ;;  %v1265_v61 = vpop.f32.mrb[22].mxu0  ;;  %v1313_v62 = vpop.f32.mrb[22].mxu1  ;;  %v996_v53 = vmax.f32 (!%p1212_p13), %v964_v50, 0.0  ;;  %v997_v54 = vmax.f32 (!%p1212_p13), %v965_v51, 0.0  ;;  %v967_v56 = vld [vmem:[#allocation2 + $0x20] sm:$0xff] (!%p1212_p13)  ;;  %1027 = vst [vmem:[%s1678_s26] sm:$0xff] (!%p1212_p13), %v995_v52 }
 0x165   : > { %v1266_v0 = vpop.f32.mrb[23].mxu0  ;;  %v1314_v2 = vpop.f32.mrb[23].mxu1 }
 0x166   : > { %v905_v3 = vadd.f32 %v1264_v59, %v392_v55  ;;  %v921_v4 = vadd.f32 %v1312_v60, %v408_v57  ;;  %v1267_v5 = vadd.f32 %v1266_v0, %v1265_v61  ;;  %v1315_v6 = vadd.f32 %v1314_v2, %v1313_v62  ;;  %v966_v55 = vld [vmem:[#allocation2 + $0x18] sm:$0xff] (!%p1212_p13)  ;;  %v968_v57 = vld [vmem:[#allocation2 + $0x28] sm:$0xff] (!%p1212_p13)  ;;  %v969_v61 = vld [vmem:[#allocation2 + $0x30] sm:$0xff] (!%p1212_p13)  ;;  %1028 = vst [vmem:[%s1678_s26 + $0x8] sm:$0xff] (!%p1212_p13), %v996_v53 }
 0x167   : > { %v998_v58 = vmax.f32 (!%p1212_p13), %v966_v55, 0.0  ;;  %v999_v59 = vmax.f32 (!%p1212_p13), %v967_v56, 0.0  ;;  %v1000_v60 = vmax.f32 (!%p1212_p13), %v968_v57, 0.0  ;;  %v970_v62 = vld [vmem:[#allocation2 + $0x38] sm:$0xff] (!%p1212_p13)  ;;  %1029 = vst [vmem:[%s1678_s26 + $0x10] sm:$0xff] (!%p1212_p13), %v997_v54  ;;  %v1001_v0 = vmax.f32 (!%p1212_p13), %v969_v61, 0.0 }
 0x168   : > { %937 = vst [vmem:[#allocation2 + $0x50] sm:$0xff] %v905_v3  ;;  %953 = vst [vmem:[#allocation2 + $0xd0] sm:$0xff] %v921_v4  ;;  %v906_v7 = vadd.f32 %v1267_v5, %v393_v63  ;;  %v922_v8 = vadd.f32 %v1315_v6, %v409_v1  ;;  %v971_v63 = vld [vmem:[#allocation2 + $0x40] sm:$0xff] (!%p1212_p13)  ;;  %v1002_v1 = vmax.f32 (!%p1212_p13), %v970_v62, 0.0 }
 0x169   : > { %v1003_v2 = vmax.f32 (!%p1212_p13), %v971_v63, 0.0  ;;  %v972_v3 = vld [vmem:[#allocation2 + $0x48] sm:$0xff] (!%p1212_p13)  ;;  %1030 = vst [vmem:[%s1678_s26 + $0x18] sm:$0xff] (!%p1212_p13), %v998_v58  ;;  %1031 = vst [vmem:[%s1678_s26 + $0x20] sm:$0xff] (!%p1212_p13), %v999_v59 }
 0x16a   : > { %938 = vst [vmem:[#allocation2 + $0x58] sm:$0xff] %v906_v7  ;;  %954 = vst [vmem:[#allocation2 + $0xd8] sm:$0xff] %v922_v8  ;;  %v1268_v9 = vpop.f32.mrb[24].mxu0  ;;  %v1316_v10 = vpop.f32.mrb[24].mxu1  ;;  %v1004_v6 = vmax.f32 (!%p1212_p13), %v972_v3, 0.0 }
 0x16b   : > { %v1269_v12 = vpop.f32.mrb[25].mxu0  ;;  %v1317_v14 = vpop.f32.mrb[25].mxu1  ;;  %1032 = vst [vmem:[%s1678_s26 + $0x28] sm:$0xff] (!%p1212_p13), %v1000_v60  ;;  %1033 = vst [vmem:[%s1678_s26 + $0x30] sm:$0xff] (!%p1212_p13), %v1001_v0 }
 0x16c   : > { %v1270_v15 = vadd.f32 %v1269_v12, %v1268_v9  ;;  %v1318_v16 = vadd.f32 %v1317_v14, %v1316_v10  ;;  %v1271_v17 = vpop.f32.mrb[26].mxu0  ;;  %v1319_v18 = vpop.f32.mrb[26].mxu1  ;;  %1034 = vst [vmem:[%s1678_s26 + $0x38] sm:$0xff] (!%p1212_p13), %v1002_v1  ;;  %1035 = vst [vmem:[%s1678_s26 + $0x40] sm:$0xff] (!%p1212_p13), %v1003_v2 }
 0x16d   : > { %v1272_v20 = vpop.f32.mrb[27].mxu0  ;;  %v1320_v22 = vpop.f32.mrb[27].mxu1  ;;  %1036 = vst [vmem:[%s1678_s26 + $0x48] sm:$0xff] (!%p1212_p13), %v1004_v6 }
 0x16e   : > { %v907_v23 = vadd.f32 %v1270_v15, %v394_v11  ;;  %v923_v24 = vadd.f32 %v1318_v16, %v410_v13  ;;  %v1273_v25 = vadd.f32 %v1272_v20, %v1271_v17  ;;  %v1321_v26 = vadd.f32 %v1320_v22, %v1319_v18  ;;  %v979_v16 = vld [vmem:[#allocation2 + $0x80] sm:$0xff] (!%p1212_p13)  ;;  %v980_v17 = vld [vmem:[#allocation2 + $0x88] sm:$0xff] (!%p1212_p13)  ;;  %v982_v22 = vld [vmem:[#allocation2 + $0x98] sm:$0xff] (!%p1212_p13) }
 0x16f   : > { %v973_v4 = vld [vmem:[#allocation2 + $0x50] sm:$0xff] (!%p1212_p13)  ;;  %v1012_v20 = vmax.f32 (!%p1212_p13), %v980_v17, 0.0 }
 0x170   : > { %939 = vst [vmem:[#allocation2 + $0x60] sm:$0xff] %v907_v23  ;;  %955 = vst [vmem:[#allocation2 + $0xe0] sm:$0xff] %v923_v24  ;;  %v908_v27 = vadd.f32 %v1273_v25, %v395_v19  ;;  %v924_v28 = vadd.f32 %v1321_v26, %v411_v21  ;;  %v1005_v7 = vmax.f32 (!%p1212_p13), %v973_v4, 0.0  ;;  %v1011_v19 = vmax.f32 (!%p1212_p13), %v979_v16, 0.0  ;;  %v981_v21 = vld [vmem:[#allocation2 + $0x90] sm:$0xff] (!%p1212_p13)  ;;  %v983_v23 = vld [vmem:[#allocation2 + $0xa0] sm:$0xff] (!%p1212_p13) }
 0x171   : > { %v974_v5 = vld [vmem:[#allocation2 + $0x58] sm:$0xff] (!%p1212_p13)  ;;  %v1013_v24 = vmax.f32 (!%p1212_p13), %v981_v21, 0.0  ;;  %v1014_v25 = vmax.f32 (!%p1212_p13), %v982_v22, 0.0  ;;  %v1015_v26 = vmax.f32 (!%p1212_p13), %v983_v23, 0.0  ;;  %1044 = vst [vmem:[%s1678_s26 + $0x88] sm:$0xff] (!%p1212_p13), %v1012_v20 }
 0x172   : > { %940 = vst [vmem:[#allocation2 + $0x68] sm:$0xff] %v908_v27  ;;  %956 = vst [vmem:[#allocation2 + $0xe8] sm:$0xff] %v924_v28  ;;  %v1274_v29 = vpop.f32.mrb[28].mxu0  ;;  %v1322_v30 = vpop.f32.mrb[28].mxu1  ;;  %v1006_v8 = vmax.f32 (!%p1212_p13), %v974_v5, 0.0  ;;  %v984_v27 = vld [vmem:[#allocation2 + $0xa8] sm:$0xff] (!%p1212_p13) }
 0x173   : > { %v1275_v32 = vpop.f32.mrb[29].mxu0  ;;  %v1323_v34 = vpop.f32.mrb[29].mxu1  ;;  %1037 = vst [vmem:[%s1678_s26 + $0x50] sm:$0xff] (!%p1212_p13), %v1005_v7  ;;  %v985_v28 = vld [vmem:[#allocation2 + $0xb0] sm:$0xff] (!%p1212_p13)  ;;  %1043 = vst [vmem:[%s1678_s26 + $0x80] sm:$0xff] (!%p1212_p13), %v1011_v19 }
 0x174   : > { %v1276_v35 = vadd.f32 %v1275_v32, %v1274_v29  ;;  %v1324_v36 = vadd.f32 %v1323_v34, %v1322_v30  ;;  %v1277_v37 = vpop.f32.mrb[30].mxu0  ;;  %v1325_v38 = vpop.f32.mrb[30].mxu1  ;;  %962 = sbr.rel (%p1212_p13) target bundleno = 390 (0x186), region = 74  ;;  %1038 = vst [vmem:[%s1678_s26 + $0x58] sm:$0xff] (!%p1212_p13), %v1006_v8  ;;  %v986_v29 = vld [vmem:[#allocation2 + $0xb8] sm:$0xff] (!%p1212_p13)  ;;  %v1016_v30 = vmax.f32 (!%p1212_p13), %v984_v27, 0.0 }
 0x175   : > { %v1278_v40 = vpop.f32.mrb[31].mxu0  ;;  %v1326_v42 = vpop.f32.mrb[31].mxu1  ;;  %v1018_v32 = vmax.f32 (!%p1212_p13), %v986_v29, 0.0  ;;  %v988_v34 = vld [vmem:[#allocation2 + $0xc8] sm:$0xff] (!%p1212_p13)  ;;  %1045 = vst [vmem:[%s1678_s26 + $0x90] sm:$0xff] (!%p1212_p13), %v1013_v24  ;;  %1046 = vst [vmem:[%s1678_s26 + $0x98] sm:$0xff] (!%p1212_p13), %v1014_v25 }
 0x176   : > { %v909_v43 = vadd.f32 %v1276_v35, %v396_v31  ;;  %v925_v44 = vadd.f32 %v1324_v36, %v412_v33  ;;  %v1279_v45 = vadd.f32 %v1278_v40, %v1277_v37  ;;  %v1327_v46 = vadd.f32 %v1326_v42, %v1325_v38  ;;  %v987_v33 = vld [vmem:[#allocation2 + $0xc0] sm:$0xff] (!%p1212_p13)  ;;  %v989_v35 = vld [vmem:[#allocation2 + $0xd0] sm:$0xff] (!%p1212_p13)  ;;  %1047 = vst [vmem:[%s1678_s26 + $0xa0] sm:$0xff] (!%p1212_p13), %v1015_v26 }
 0x177   : > { %v975_v9 = vld [vmem:[#allocation2 + $0x60] sm:$0xff] (!%p1212_p13)  ;;  %v1017_v31 = vmax.f32 (!%p1212_p13), %v985_v28, 0.0  ;;  %v1019_v36 = vmax.f32 (!%p1212_p13), %v987_v33, 0.0  ;;  %v1020_v37 = vmax.f32 (!%p1212_p13), %v988_v34, 0.0  ;;  %v1021_v38 = vmax.f32 (!%p1212_p13), %v989_v35, 0.0  ;;  %1048 = vst [vmem:[%s1678_s26 + $0xa8] sm:$0xff] (!%p1212_p13), %v1016_v30 }
 0x178   : > { %941 = vst [vmem:[#allocation2 + $0x70] sm:$0xff] %v909_v43  ;;  %957 = vst [vmem:[#allocation2 + $0xf0] sm:$0xff] %v925_v44  ;;  %v910_v47 = vadd.f32 %v1279_v45, %v397_v39  ;;  %v926_v48 = vadd.f32 %v1327_v46, %v413_v41  ;;  %v1007_v12 = vmax.f32 (!%p1212_p13), %v975_v9, 0.0  ;;  %v990_v39 = vld [vmem:[#allocation2 + $0xd8] sm:$0xff] (!%p1212_p13)  ;;  %v991_v40 = vld [vmem:[#allocation2 + $0xe0] sm:$0xff] (!%p1212_p13) }
 0x179   : > { %v976_v10 = vld [vmem:[#allocation2 + $0x68] sm:$0xff] (!%p1212_p13)  ;;  %1049 = vst [vmem:[%s1678_s26 + $0xb0] sm:$0xff] (!%p1212_p13), %v1017_v31  ;;  %1050 = vst [vmem:[%s1678_s26 + $0xb8] sm:$0xff] (!%p1212_p13), %v1018_v32  ;;  %v1022_v42 = vmax.f32 (!%p1212_p13), %v990_v39, 0.0  ;;  %v1023_v43 = vmax.f32 (!%p1212_p13), %v991_v40, 0.0 }
 0x17a   : > { %942 = vst [vmem:[#allocation2 + $0x78] sm:$0xff] %v910_v47  ;;  %958 = vst [vmem:[#allocation2 + $0xf8] sm:$0xff] %v926_v48  ;;  %v1008_v13 = vmax.f32 (!%p1212_p13), %v976_v10, 0.0  ;;  %v992_v41 = vld [vmem:[#allocation2 + $0xe8] sm:$0xff] (!%p1212_p13) }
 0x17b   : > { %1039 = vst [vmem:[%s1678_s26 + $0x60] sm:$0xff] %v1007_v12  ;;  %v1024_v44 = vmax.f32 %v992_v41, 0.0  ;;  %1051 = vst [vmem:[%s1678_s26 + $0xc0] sm:$0xff] %v1019_v36 }
 0x17c   : > { %1040 = vst [vmem:[%s1678_s26 + $0x68] sm:$0xff] %v1008_v13  ;;  %1052 = vst [vmem:[%s1678_s26 + $0xc8] sm:$0xff] %v1020_v37 }
 0x17d   : > { %1053 = vst [vmem:[%s1678_s26 + $0xd0] sm:$0xff] %v1021_v38  ;;  %1054 = vst [vmem:[%s1678_s26 + $0xd8] sm:$0xff] %v1022_v42 }
 0x17e   : > { %1055 = vst [vmem:[%s1678_s26 + $0xe0] sm:$0xff] %v1023_v43  ;;  %1056 = vst [vmem:[%s1678_s26 + $0xe8] sm:$0xff] %v1024_v44 }
 0x17f   : > { %v977_v11 = vld [vmem:[#allocation2 + $0x70] sm:$0xff] }
 0x180   : > { %v1009_v14 = vmax.f32 %v977_v11, 0.0  ;;  %v993_v45 = vld [vmem:[#allocation2 + $0xf0] sm:$0xff] }
 0x181   : > { %v978_v15 = vld [vmem:[#allocation2 + $0x78] sm:$0xff]  ;;  %v1025_v47 = vmax.f32 %v993_v45, 0.0 }
 0x182   : > { %v1010_v18 = vmax.f32 %v978_v15, 0.0  ;;  %1041 = vst [vmem:[%s1678_s26 + $0x70] sm:$0xff] %v1009_v14  ;;  %v994_v46 = vld [vmem:[#allocation2 + $0xf8] sm:$0xff] }
 0x183   : > { %v1026_v48 = vmax.f32 %v994_v46, 0.0  ;;  %1057 = vst [vmem:[%s1678_s26 + $0xf0] sm:$0xff] %v1025_v47 }
 0x184   : > { %1042 = vst [vmem:[%s1678_s26 + $0x78] sm:$0xff] %v1010_v18 }
 0x185   : > { %1058 = vst [vmem:[%s1678_s26 + $0xf8] sm:$0xff] %v1026_v48 }
 0x186 PF: > { %s12_s15 = sadd.s32 1, %s1519_s15   ;;  %s1788_s9 = smov %s1499_s10 }
 0x187   : > { %p9_p0 = scmp.ge.s32.totalorder %s12_s15, 6   ;;  %s1789_s10 = smov %s1588_s22 }
 0x188   : > { %s1790_s11 = smov %s1511_s13  ;;  %s1791_s12 = smov %s1515_s14 }
 0x189   : > { %s1792_s13 = smov %s1795_s16  ;;  %s1793_s14 = smov %s1799_s17 }
 0x18a   :  { %11 = sbr.rel (!%p9_p0) target bundleno = 4 (0x4), region = 112 }

</bundles_post_ra>
